<compile_context>
chip_gen: v7x
topology: tpu7x:2x2x1
jax: 0.10.0
libtpu: 0.0.40
codegen_flags: <defaults>
</compile_context>

<pallas_src>
from functools import partial

import numpy as np
import jax
import jax.numpy as jnp
from jax.experimental import pallas as pl
from jax.experimental.pallas import tpu as pltpu


def _round_up(x, m):
    return ((x + m - 1) // m) * m


def _fused_step_kernel(L, att_ref, nv_ref, race_ref, feat_ref,
                       t1_ref, t2_ref, t3a_ref, t3b_ref,
                       state_ref, spread_ref, aux_ref):
    Bt, Lp = att_ref.shape

    # ---- sample_node_label: neighbour-weighted attention spread -------------
    att = att_ref[...]                                               # (Bt, Lp) f32
    neighbor_features = jnp.dot(nv_ref[...], feat_ref[...],
                                preferred_element_type=jnp.float32)  # (Bt, Lp) f32
    spread = att * neighbor_features                                 # 0 on padded lanes
    total = jnp.sum(spread, axis=-1, keepdims=True)                  # padded lanes are 0
    spread_ref[...] = spread / jnp.maximum(total, 1e-30)             # exact normalization

    # ---- categorical sample via exponential race -----------------------------
    # argmax_i spread_i / E_i with E_i ~ Exp(1)  ==  Categorical(spread / sum).
    lane = jax.lax.broadcasted_iota(jnp.int32, (Bt, Lp), 1)
    valid = (spread > 0.0) & (lane < L)                              # mask padded lanes
    race_key = jnp.where(valid, spread * race_ref[...], -1.0)
    row_max = jnp.max(race_key, axis=-1, keepdims=True)
    label = jnp.min(jnp.where(race_key == row_max, lane, Lp),
                    axis=-1, keepdims=True)                          # (Bt, 1) int32
    label = jnp.where(total > 0.0, label, 0)                         # degenerate-row clamp

    # ---- make_step: one-hot row + attention score of the chosen label -------
    onehot = (lane == label)
    ascore = jnp.sum(att * onehot.astype(jnp.float32), axis=-1, keepdims=True)

    # ---- forward(): state = [att@t1 | onehot@t2] @ t3 (split, bf16 MXU) -----
    bf16 = jnp.bfloat16
    h1 = jnp.dot(att.astype(bf16), t1_ref[...], preferred_element_type=jnp.float32)
    h2 = jnp.dot(onehot.astype(bf16), t2_ref[...], preferred_element_type=jnp.float32)
    state_ref[...] = (
        jnp.dot(h1.astype(bf16), t3a_ref[...], preferred_element_type=jnp.float32)
        + jnp.dot(h2.astype(bf16), t3b_ref[...], preferred_element_type=jnp.float32))

    # ---- lane-dense aux output: lane 0 = attention score, lane 1 = label ----
    lane_out = jax.lax.broadcasted_iota(jnp.int32, aux_ref.shape, 1)
    aux = jnp.where(lane_out == 0, ascore, 0.0)
    aux_ref[...] = jnp.where(lane_out == 1, label.astype(jnp.float32), aux)


def prepare_step_network_params(features, theta1, theta2, theta3):
    """One-time padding + bf16 cast of the static graph/weight tensors.

    Hoisted out of the per-step jitted call so the hot path only moves the
    genuinely per-step data (attention rows, neighbour masks, sampling noise).
    """
    N, L = features.shape
    S = theta1.shape[1]
    C = theta3.shape[1]
    Lp, Np, Cp = _round_up(L, 128), _round_up(N, 128), _round_up(C, 128)
    bf16 = jnp.bfloat16
    feat_p = jnp.zeros((Np, Lp), bf16).at[:N, :L].set(features.astype(bf16))
    t1_p = jnp.zeros((Lp, S), bf16).at[:L, :].set(theta1.astype(bf16))
    t2_p = jnp.zeros((Lp, S), bf16).at[:L, :].set(theta2.astype(bf16))
    t3a = jnp.zeros((S, Cp), bf16).at[:, :C].set(theta3[:S, :].astype(bf16))
    t3b = jnp.zeros((S, Cp), bf16).at[:, :C].set(theta3[S:, :].astype(bf16))
    return feat_p, t1_p, t2_p, t3a, t3b


@partial(jax.jit, static_argnames=("combined_dim", "block_b"))
def step_network_forward(attention, neighbor_vector, noise_key,
                         feat_p, t1_p, t2_p, t3a, t3b,
                         *, combined_dim, block_b=128):
    """Batched StepNetworkLayer step.

    attention        (B, L)   per-step attention row (self.attention)
    neighbor_vector  (B, N)   0/1 neighbourhood mask of each step's source node
    feat_p,t1_p,t2_p,t3a,t3b  outputs of prepare_step_network_params
    Returns (state (B,1,C), normalized_spread (B,L), label (B,), attention_score (B,))
    """
    B, L = attention.shape
    N = neighbor_vector.shape[1]
    Np, Lp = feat_p.shape
    S = t1_p.shape[1]
    Cp = t3a.shape[1]
    C = combined_dim
    if B % block_b:
        raise ValueError("batch must be a multiple of block_b")

    f32, bf16 = jnp.float32, jnp.bfloat16
    att_p = jnp.zeros((B, Lp), f32).at[:, :L].set(attention.astype(f32))
    nv_p = jnp.zeros((B, Np), bf16).at[:, :N].set(neighbor_vector.astype(bf16))

    # Exponential-race noise, generated outside the kernel (portable PRNG).
    exp_noise = jax.random.exponential(noise_key, (B, Lp), f32)
    race = 1.0 / jnp.maximum(exp_noise, 1e-20)

    kernel = partial(_fused_step_kernel, L)
    out_shape = (
        jax.ShapeDtypeStruct((B, Cp), f32),     # padded state
        jax.ShapeDtypeStruct((B, Lp), f32),     # padded normalized spread
        jax.ShapeDtypeStruct((B, 128), f32),    # aux: lane0=ascore, lane1=label
    )
    # NOTE(perf, v7x): at realistic L/N, single-buffer the constant-index_map
    # residents below (features + weights) via pipeline_mode=pl.Buffered(1)
    # and pass vmem_limit_bytes explicitly to respect the 64 MiB VMEM.
    grid_spec = pltpu.PrefetchScalarGridSpec(
        num_scalar_prefetch=0,
        grid=(B // block_b,),
        in_specs=[
            pl.BlockSpec((block_b, Lp), lambda i: (i, 0)),   # attention (f32)
            pl.BlockSpec((block_b, Np), lambda i: (i, 0)),   # neighbour mask (bf16)
            pl.BlockSpec((block_b, Lp), lambda i: (i, 0)),   # race noise (f32)
            pl.BlockSpec((Np, Lp), lambda i: (0, 0)),        # features (resident)
            pl.BlockSpec((Lp, S), lambda i: (0, 0)),         # theta1 (resident)
            pl.BlockSpec((Lp, S), lambda i: (0, 0)),         # theta2 (resident)
            pl.BlockSpec((S, Cp), lambda i: (0, 0)),         # theta3 top half
            pl.BlockSpec((S, Cp), lambda i: (0, 0)),         # theta3 bottom half
        ],
        out_specs=[
            pl.BlockSpec((block_b, Cp), lambda i: (i, 0)),
            pl.BlockSpec((block_b, Lp), lambda i: (i, 0)),
            pl.BlockSpec((block_b, 128), lambda i: (i, 0)),
        ],
    )

    flops = 2 * B * (Np * Lp + 2 * Lp * S + 2 * S * Cp)
    bytes_accessed = sum(int(np.prod(a.shape)) * a.dtype.itemsize
                         for a in (att_p, nv_p, race, feat_p, t1_p, t2_p, t3a, t3b))
    bytes_accessed += B * (Cp + Lp + 128) * 4

    state_p, spread_p, aux = pl.pallas_call(
        kernel,
        out_shape=out_shape,
        grid_spec=grid_spec,
        cost_estimate=pl.CostEstimate(flops=flops, transcendentals=0,
                                      bytes_accessed=bytes_accessed),
        compiler_params=pltpu.CompilerParams(
            dimension_semantics=("parallel",)),
    )(att_p, nv_p, race, feat_p, t1_p, t2_p, t3a, t3b)

    state = state_p[:, :C].reshape(B, 1, C)     # == state.view(1, 1, C) per step
    label = aux[:, 1].astype(jnp.int32)
    attention_score = aux[:, 0]
    return state, spread_p[:, :L], label, attention_score


if __name__ == "__main__":
    # Shapes consistent with the module: L = #label types (identifiers),
    # S = step_dimensions, C = combined_dimensions, N graph nodes,
    # B independent steps batched per call.
    L, S, C, N = 8, 32, 64, 16
    block_b = 128
    B = 2 * block_b          # two grid steps -> both v7x TensorCores get work

    key = jax.random.PRNGKey(0)
    k1, k2, k3, k4, k5, k_noise = jax.random.split(key, 6)

    # create_parameters(): uniform(-1, 1)
    theta1 = jax.random.uniform(k1, (L, S), jnp.float32, -1.0, 1.0)
    theta2 = jax.random.uniform(k2, (L, S), jnp.float32, -1.0, 1.0)
    theta3 = jax.random.uniform(k3, (2 * S, C), jnp.float32, -1.0, 1.0)

    # setup_attention(): uniform attention, replicated across the B batched steps.
    attention = jnp.ones((B, L), jnp.float32) / L

    # Synthetic graph stand-ins: node features + per-step neighbourhood masks.
    features = jax.random.uniform(k4, (N, L), jnp.float32, 0.0, 1.0)
    neighbor_vector = (jax.random.uniform(k5, (B, N)) > 0.5).astype(jnp.float32)
    neighbor_vector = neighbor_vector.at[:, 0].set(1.0)   # ensure non-empty hood
    # TODO(synk): networkx neighbour extraction + random.choice(new_node) in
    # make_step have no Pallas equivalent; neighbor_vector and the sampled
    # label stand in for them (the graph-side node pick stays on the host).

    feat_p, t1_p, t2_p, t3a, t3b = prepare_step_network_params(
        features, theta1, theta2, theta3)

    state, spread, labels, att_scores = jax.block_until_ready(
        step_network_forward(attention, neighbor_vector, k_noise,
                             feat_p, t1_p, t2_p, t3a, t3b,
                             combined_dim=C, block_b=block_b))

    # ---- plain numpy reference of the module math ---------------------------
    att_np = np.asarray(attention, np.float64)
    nv_np = np.asarray(neighbor_vector, np.float64)
    feat_np = np.asarray(features, np.float64)
    t1_np = np.asarray(theta1, np.float64)
    t2_np = np.asarray(theta2, np.float64)
    t3_np = np.asarray(theta3, np.float64)

    spread_ref = att_np * (nv_np @ feat_np)
    norm_ref = spread_ref / spread_ref.sum(axis=1, keepdims=True)
    np.testing.assert_allclose(np.asarray(spread), norm_ref, rtol=2e-2, atol=1e-4)

    labels_np = np.asarray(labels)
    assert labels_np.shape == (B,)
    assert labels_np.min() >= 0 and labels_np.max() < L
    assert np.all(norm_ref[np.arange(B), labels_np] > 0.0)
    # TODO(synk): the exponential-race sample matches np.random.choice's
    # categorical distribution but not numpy's exact RNG stream.

    onehot_np = np.eye(L, dtype=np.float64)[labels_np]
    state_ref = np.concatenate([att_np @ t1_np, onehot_np @ t2_np], axis=1) @ t3_np
    np.testing.assert_allclose(np.asarray(state).reshape(B, C), state_ref,
                               rtol=5e-2, atol=5e-2)
    np.testing.assert_allclose(np.asarray(att_scores),
                               att_np[np.arange(B), labels_np],
                               rtol=1e-5, atol=1e-6)

    print("KERNEL_OK")
</pallas_src>

<mosaic_0001>
module attributes {stable_mosaic.version = 11 : i64} {
  func.func @_fused_step_kernel(%arg0: i32, %arg1: memref<128x128xf32, #tpu.memory_space<vmem>>, %arg2: memref<128x128xbf16, #tpu.memory_space<vmem>>, %arg3: memref<128x128xf32, #tpu.memory_space<vmem>>, %arg4: memref<128x128xbf16, #tpu.memory_space<vmem>>, %arg5: memref<128x32xbf16, #tpu.memory_space<vmem>>, %arg6: memref<128x32xbf16, #tpu.memory_space<vmem>>, %arg7: memref<32x128xbf16, #tpu.memory_space<vmem>>, %arg8: memref<32x128xbf16, #tpu.memory_space<vmem>>, %arg9: memref<128x128xf32, #tpu.memory_space<vmem>>, %arg10: memref<128x128xf32, #tpu.memory_space<vmem>>, %arg11: memref<128x128xf32, #tpu.memory_space<vmem>>) attributes {dimension_semantics = [#tpu.dimension_semantics<parallel>], iteration_bounds = array<i64: 2>, scalar_prefetch = 0 : i64, scratch_operands = 0 : i64, tpu.core_type = #tpu.core_type<tc>, window_params = [{transform_indices = @transform_0, window_bounds = array<i64: 128, 128>}, {transform_indices = @transform_1, window_bounds = array<i64: 128, 128>}, {transform_indices = @transform_2, window_bounds = array<i64: 128, 128>}, {pipeline_mode = #tpu.pipeline_mode<synchronous>, transform_indices = @transform_3, window_bounds = array<i64: 128, 128>}, {pipeline_mode = #tpu.pipeline_mode<synchronous>, transform_indices = @transform_4, window_bounds = array<i64: 128, 32>}, {pipeline_mode = #tpu.pipeline_mode<synchronous>, transform_indices = @transform_5, window_bounds = array<i64: 128, 32>}, {pipeline_mode = #tpu.pipeline_mode<synchronous>, transform_indices = @transform_6, window_bounds = array<i64: 32, 128>}, {pipeline_mode = #tpu.pipeline_mode<synchronous>, transform_indices = @transform_7, window_bounds = array<i64: 32, 128>}, {transform_indices = @transform_8, window_bounds = array<i64: 128, 128>}, {transform_indices = @transform_9, window_bounds = array<i64: 128, 128>}, {transform_indices = @transform_10, window_bounds = array<i64: 128, 128>}]} {
    %c0 = arith.constant 0 : index
    %c0_0 = arith.constant 0 : index
    %0 = vector.load %arg1[%c0, %c0_0] : memref<128x128xf32, #tpu.memory_space<vmem>>, vector<128x128xf32>
    %c0_1 = arith.constant 0 : index
    %c0_2 = arith.constant 0 : index
    %1 = vector.load %arg2[%c0_1, %c0_2] : memref<128x128xbf16, #tpu.memory_space<vmem>>, vector<128x128xbf16>
    %c0_3 = arith.constant 0 : index
    %c0_4 = arith.constant 0 : index
    %2 = vector.load %arg4[%c0_3, %c0_4] : memref<128x128xbf16, #tpu.memory_space<vmem>>, vector<128x128xbf16>
    %cst = arith.constant dense<0.000000e+00> : vector<128x128xf32>
    %3 = tpu.matmul %1, %2, %cst {dimension_numbers = #tpu.dot_dimension_numbers<[1], [0], [0], [1], [0, 0, 1, 1], [], []>} : vector<128x128xbf16>, vector<128x128xbf16>, vector<128x128xf32> -> vector<128x128xf32>
    %4 = arith.mulf %0, %3 : vector<128x128xf32>
    %cst_5 = arith.constant dense<0.000000e+00> : vector<128xf32>
    %5 = vector.multi_reduction <add>, %4, %cst_5 [1] : vector<128x128xf32> to vector<128xf32>
    %6 = vector.shape_cast %5 : vector<128xf32> to vector<128x1xf32>
    %cst_6 = arith.constant 1.000000e-30 : f32
    %7 = vector.broadcast %cst_6 : f32 to vector<128x1xf32>
    %8 = arith.maximumf %6, %7 : vector<128x1xf32>
    %9 = vector.broadcast %8 : vector<128x1xf32> to vector<128x128xf32>
    %10 = arith.divf %4, %9 : vector<128x128xf32>
    %c0_7 = arith.constant 0 : index
    %c0_8 = arith.constant 0 : index
    %11 = vector.load %arg10[%c0_7, %c0_8] : memref<128x128xf32, #tpu.memory_space<vmem>>, vector<128x128xf32>
    tpu.vector_store %arg10[%c0_7, %c0_8], %10 {strides = array<i32>} : memref<128x128xf32, #tpu.memory_space<vmem>>, vector<128x128xf32>,
    %12 = tpu.iota {dimensions = array<i32: 1>} : vector<128x128xi32>
    %cst_9 = arith.constant 0.000000e+00 : f32
    %13 = vector.broadcast %cst_9 : f32 to vector<128x128xf32>
    %14 = arith.cmpf ogt, %4, %13 : vector<128x128xf32>
    %c8_i32 = arith.constant 8 : i32
    %15 = vector.broadcast %c8_i32 : i32 to vector<128x128xi32>
    %16 = arith.cmpi slt, %12, %15 : vector<128x128xi32>
    %17 = arith.andi %14, %16 : vector<128x128xi1>
    %c0_10 = arith.constant 0 : index
    %c0_11 = arith.constant 0 : index
    %18 = vector.load %arg3[%c0_10, %c0_11] : memref<128x128xf32, #tpu.memory_space<vmem>>, vector<128x128xf32>
    %19 = arith.mulf %4, %18 : vector<128x128xf32>
    %cst_12 = arith.constant -1.000000e+00 : f32
    %20 = vector.broadcast %cst_12 : f32 to vector<128x128xf32>
    %21 = arith.select %17, %19, %20 : vector<128x128xi1>, vector<128x128xf32>
    %cst_13 = arith.constant dense<0xFF800000> : vector<128xf32>
    %22 = vector.multi_reduction <maximumf>, %21, %cst_13 [1] : vector<128x128xf32> to vector<128xf32>
    %23 = vector.shape_cast %22 : vector<128xf32> to vector<128x1xf32>
    %24 = vector.broadcast %23 : vector<128x1xf32> to vector<128x128xf32>
    %25 = arith.cmpf oeq, %21, %24 : vector<128x128xf32>
    %c128_i32 = arith.constant 128 : i32
    %26 = vector.broadcast %c128_i32 : i32 to vector<128x128xi32>
    %27 = arith.select %25, %12, %26 : vector<128x128xi1>, vector<128x128xi32>
    %cst_14 = arith.constant dense<2147483647> : vector<128xi32>
    %28 = vector.multi_reduction <minsi>, %27, %cst_14 [1] : vector<128x128xi32> to vector<128xi32>
    %29 = vector.shape_cast %28 : vector<128xi32> to vector<128x1xi32>
    %cst_15 = arith.constant 0.000000e+00 : f32
    %30 = vector.broadcast %cst_15 : f32 to vector<128x1xf32>
    %31 = arith.cmpf ogt, %6, %30 : vector<128x1xf32>
    %c0_i32 = arith.constant 0 : i32
    %32 = vector.broadcast %c0_i32 : i32 to vector<128x1xi32>
    %33 = arith.select %31, %29, %32 : vector<128x1xi1>, vector<128x1xi32>
    %34 = vector.broadcast %33 : vector<128x1xi32> to vector<128x128xi32>
    %35 = arith.cmpi eq, %12, %34 : vector<128x128xi32>
    %36 = arith.extui %35 : vector<128x128xi1> to vector<128x128xi32>
    %37 = arith.sitofp %36 : vector<128x128xi32> to vector<128x128xf32>
    %38 = arith.mulf %0, %37 : vector<128x128xf32>
    %cst_16 = arith.constant dense<0.000000e+00> : vector<128xf32>
    %39 = vector.multi_reduction <add>, %38, %cst_16 [1] : vector<128x128xf32> to vector<128xf32>
    %40 = vector.shape_cast %39 : vector<128xf32> to vector<128x1xf32>
    %41 = arith.truncf %0 : vector<128x128xf32> to vector<128x128xbf16>
    %c0_17 = arith.constant 0 : index
    %c0_18 = arith.constant 0 : index
    %42 = vector.load %arg5[%c0_17, %c0_18] : memref<128x32xbf16, #tpu.memory_space<vmem>>, vector<128x32xbf16>
    %cst_19 = arith.constant dense<0.000000e+00> : vector<128x32xf32>
    %43 = tpu.matmul %41, %42, %cst_19 {dimension_numbers = #tpu.dot_dimension_numbers<[1], [0], [0], [1], [0, 0, 1, 1], [], []>} : vector<128x128xbf16>, vector<128x32xbf16>, vector<128x32xf32> -> vector<128x32xf32>
    %44 = arith.extui %35 : vector<128x128xi1> to vector<128x128xi32>
    %45 = arith.sitofp %44 : vector<128x128xi32> to vector<128x128xf32>
    %46 = arith.truncf %45 : vector<128x128xf32> to vector<128x128xbf16>
    %c0_20 = arith.constant 0 : index
    %c0_21 = arith.constant 0 : index
    %47 = vector.load %arg6[%c0_20, %c0_21] : memref<128x32xbf16, #tpu.memory_space<vmem>>, vector<128x32xbf16>
    %cst_22 = arith.constant dense<0.000000e+00> : vector<128x32xf32>
    %48 = tpu.matmul %46, %47, %cst_22 {dimension_numbers = #tpu.dot_dimension_numbers<[1], [0], [0], [1], [0, 0, 1, 1], [], []>} : vector<128x128xbf16>, vector<128x32xbf16>, vector<128x32xf32> -> vector<128x32xf32>
    %49 = arith.truncf %43 : vector<128x32xf32> to vector<128x32xbf16>
    %c0_23 = arith.constant 0 : index
    %c0_24 = arith.constant 0 : index
    %50 = vector.load %arg7[%c0_23, %c0_24] : memref<32x128xbf16, #tpu.memory_space<vmem>>, vector<32x128xbf16>
    %cst_25 = arith.constant dense<0.000000e+00> : vector<128x128xf32>
    %51 = tpu.matmul %49, %50, %cst_25 {dimension_numbers = #tpu.dot_dimension_numbers<[1], [0], [0], [1], [0, 0, 1, 1], [], []>} : vector<128x32xbf16>, vector<32x128xbf16>, vector<128x128xf32> -> vector<128x128xf32>
    %52 = arith.truncf %48 : vector<128x32xf32> to vector<128x32xbf16>
    %c0_26 = arith.constant 0 : index
    %c0_27 = arith.constant 0 : index
    %53 = vector.load %arg8[%c0_26, %c0_27] : memref<32x128xbf16, #tpu.memory_space<vmem>>, vector<32x128xbf16>
    %cst_28 = arith.constant dense<0.000000e+00> : vector<128x128xf32>
    %54 = tpu.matmul %52, %53, %cst_28 {dimension_numbers = #tpu.dot_dimension_numbers<[1], [0], [0], [1], [0, 0, 1, 1], [], []>} : vector<128x32xbf16>, vector<32x128xbf16>, vector<128x128xf32> -> vector<128x128xf32>
    %55 = arith.addf %51, %54 : vector<128x128xf32>
    %c0_29 = arith.constant 0 : index
    %c0_30 = arith.constant 0 : index
    %56 = vector.load %arg9[%c0_29, %c0_30] : memref<128x128xf32, #tpu.memory_space<vmem>>, vector<128x128xf32>
    tpu.vector_store %arg9[%c0_29, %c0_30], %55 {strides = array<i32>} : memref<128x128xf32, #tpu.memory_space<vmem>>, vector<128x128xf32>,
    %57 = tpu.iota {dimensions = array<i32: 1>} : vector<128x128xi32>
    %c0_i32_31 = arith.constant 0 : i32
    %58 = vector.broadcast %c0_i32_31 : i32 to vector<128x128xi32>
    %59 = arith.cmpi eq, %57, %58 : vector<128x128xi32>
    %cst_32 = arith.constant 0.000000e+00 : f32
    %60 = vector.shape_cast %40 : vector<128x1xf32> to vector<128x1xf32>
    %61 = vector.broadcast %60 : vector<128x1xf32> to vector<128x128xf32>
    %62 = vector.broadcast %cst_32 : f32 to vector<128x128xf32>
    %63 = arith.select %59, %61, %62 : vector<128x128xi1>, vector<128x128xf32>
    %c1_i32 = arith.constant 1 : i32
    %64 = vector.broadcast %c1_i32 : i32 to vector<128x128xi32>
    %65 = arith.cmpi eq, %57, %64 : vector<128x128xi32>
    %66 = arith.sitofp %33 : vector<128x1xi32> to vector<128x1xf32>
    %67 = vector.shape_cast %66 : vector<128x1xf32> to vector<128x1xf32>
    %68 = vector.broadcast %67 : vector<128x1xf32> to vector<128x128xf32>
    %69 = arith.select %65, %68, %63 : vector<128x128xi1>, vector<128x128xf32>
    %c0_33 = arith.constant 0 : index
    %c0_34 = arith.constant 0 : index
    %70 = vector.load %arg11[%c0_33, %c0_34] : memref<128x128xf32, #tpu.memory_space<vmem>>, vector<128x128xf32>
    tpu.vector_store %arg11[%c0_33, %c0_34], %69 {strides = array<i32>} : memref<128x128xf32, #tpu.memory_space<vmem>>, vector<128x128xf32>,
    return
  }
  func.func @transform_0(%arg0: i32) -> (i32, i32) {
    %c0_i32 = arith.constant 0 : i32
    %c0_i32_0 = arith.constant 0 : i32
    return %arg0, %c0_i32 : i32, i32
  }
  func.func @transform_1(%arg0: i32) -> (i32, i32) {
    %c0_i32 = arith.constant 0 : i32
    %c0_i32_0 = arith.constant 0 : i32
    return %arg0, %c0_i32 : i32, i32
  }
  func.func @transform_2(%arg0: i32) -> (i32, i32) {
    %c0_i32 = arith.constant 0 : i32
    %c0_i32_0 = arith.constant 0 : i32
    return %arg0, %c0_i32 : i32, i32
  }
  func.func @transform_3(%arg0: i32) -> (i32, i32) {
    %c0_i32 = arith.constant 0 : i32
    %c0_i32_0 = arith.constant 0 : i32
    %c0_i32_1 = arith.constant 0 : i32
    return %c0_i32, %c0_i32_0 : i32, i32
  }
  func.func @transform_4(%arg0: i32) -> (i32, i32) {
    %c0_i32 = arith.constant 0 : i32
    %c0_i32_0 = arith.constant 0 : i32
    %c0_i32_1 = arith.constant 0 : i32
    return %c0_i32, %c0_i32_0 : i32, i32
  }
  func.func @transform_5(%arg0: i32) -> (i32, i32) {
    %c0_i32 = arith.constant 0 : i32
    %c0_i32_0 = arith.constant 0 : i32
    %c0_i32_1 = arith.constant 0 : i32
    return %c0_i32, %c0_i32_0 : i32, i32
  }
  func.func @transform_6(%arg0: i32) -> (i32, i32) {
    %c0_i32 = arith.constant 0 : i32
    %c0_i32_0 = arith.constant 0 : i32
    %c0_i32_1 = arith.constant 0 : i32
    return %c0_i32, %c0_i32_0 : i32, i32
  }
  func.func @transform_7(%arg0: i32) -> (i32, i32) {
    %c0_i32 = arith.constant 0 : i32
    %c0_i32_0 = arith.constant 0 : i32
    %c0_i32_1 = arith.constant 0 : i32
    return %c0_i32, %c0_i32_0 : i32, i32
  }
  func.func @transform_8(%arg0: i32) -> (i32, i32) {
    %c0_i32 = arith.constant 0 : i32
    %c0_i32_0 = arith.constant 0 : i32
    return %arg0, %c0_i32 : i32, i32
  }
  func.func @transform_9(%arg0: i32) -> (i32, i32) {
    %c0_i32 = arith.constant 0 : i32
    %c0_i32_0 = arith.constant 0 : i32
    return %arg0, %c0_i32 : i32, i32
  }
  func.func @transform_10(%arg0: i32) -> (i32, i32) {
    %c0_i32 = arith.constant 0 : i32
    %c0_i32_0 = arith.constant 0 : i32
    return %arg0, %c0_i32 : i32, i32
  }
}

</mosaic_0001>

<bundles_post_ra>
// kernel: step_network_forward.1
= control target key start
LH: loop header
LB: loop body
LE: loop exit
PB: predicated region body
PF: predicated region fallthrough
CT: control target
= control target key end

     0   :  { %s2632_s13 = smov 0   ;;  %s3741_s0 = inlined_call_operand.vmem [shape: f32[256,128], index: 0, kind: input, shape index: {}]   ;;  %s3742_s1 = inlined_call_operand.vmem [shape: bf16[256,128], index: 1, kind: input, shape index: {}]   ;;  %s3743_s2 = inlined_call_operand.vmem [shape: f32[256,128], index: 2, kind: input, shape index: {}]   ;;  %s3744_s3 = inlined_call_operand.vmem [shape: bf16[128,128], index: 3, kind: input, shape index: {}]   ;;  %s3745_s4 = inlined_call_operand.vmem [shape: bf16[128,32], index: 4, kind: input, shape index: {}]   ;;  %s3746_s5 = inlined_call_operand.vmem [shape: bf16[128,32], index: 5, kind: input, shape index: {}]   ;;  %s3747_s6 = inlined_call_operand.vmem [shape: bf16[32,128], index: 6, kind: input, shape index: {}]   ;;  %s3748_s7 = inlined_call_operand.vmem [shape: bf16[32,128], index: 7, kind: input, shape index: {}]   ;;  %s3749_s8 = inlined_call_operand.vmem [shape: f32[256,128], index: 8, kind: output, shape index: {0}]   ;;  %s3750_s9 = inlined_call_operand.vmem [shape: f32[256,128], index: 9, kind: output, shape index: {1}]   ;;  %s3751_s10 = inlined_call_operand.vmem [shape: f32[256,128], index: 10, kind: output, shape index: {2}]  }
   0x1 LB: > { %s2146_s14 = sadd.s32 4294967295, %s2573_s13   ;;  %p2150_p0 = scmp.ge.s32.totalorder %s2573_s13, 1  ;;  %s2573_s13 = sphi %s2632_s13, %s21_s13  }
   0x2   : > { %p340_p1 = scmp.lt.s32.totalorder %s2573_s13, 3 }
   0x4   : > { %p341_p2 = pnand %p2150_p0, %p340_p1 }
   0x6   : > { %344 = sbr.rel (%p341_p2) target bundleno = 1208 (0x4b8), region = 52 }
   0xd   : > { %v2483_v0 = vld [vmem:[%s3744_s3] sm:$0xff]   ;;  %s2151_s17 = sshll.u32 %s2146_s14, 4  ;;  %v2484_v1 = vld [vmem:[%s3744_s3 + $0x8] sm:$0xff]   ;;  %v2485_v2 = vld [vmem:[%s3744_s3 + $0x10] sm:$0xff]   ;;  %v788_v16 = vlaneseq }
   0xe   : > { %p399_p3 = scmp.lt.s32.totalorder %s2151_s17, 31  ;;  %2317 = vmatprep.subr.bf16.mxu0 %v2483_v0  ;;  %v2486_v3 = vld [vmem:[%s3744_s3 + $0x18] sm:$0xff]   ;;  %v2487_v5 = vld [vmem:[%s3744_s3 + $0x20] sm:$0xff]   ;;  %v2488_v6 = vld [vmem:[%s3744_s3 + $0x28] sm:$0xff]  }
   0xf   : > { %2318 = vmatpush3.bf16.msra.mxu0 %v2483_v0  ;;  %v2489_v7 = vld [vmem:[%s3744_s3 + $0x30] sm:$0xff]   ;;  %v2490_v8 = vld [vmem:[%s3744_s3 + $0x38] sm:$0xff]   ;;  %v2695_v17 = vand.u32 127, %v788_v16 }
  0x10   : > { %s3800_s17 = smov (!%p399_p3, %s2151_s17), 31  ;;  %2319 = vmatprep.subr.bf16.mxu0 %v2484_v1 }
  0x11   : > { %s2154_s22 = sshll.u32 %s3800_s17, 2  ;;  %s2681_s18 = sshll.u32 %s3800_s17, 3  ;;  %3765 = vst [vmem:[#allocation2_spill] sm:$0xff] %v2695_v17  ;;  %vm806_vm0 = vcmp.lt.s32.totalorder %v2695_v17, 8 }
  0x12   : > { %s2658_s27 = scalar_lea.vmem %s3742_s1, %s2154_s22  ;;  %s2687_s21 = scalar_lea.vmem %s3741_s0, %s2681_s18 }
  0x13   : > { %2320 = vmatpush3.bf16.msra.mxu0 %v2484_v1  ;;  %v2491_v4 = vld [vmem:[%s2658_s27] sm:$0xff]   ;;  %v2492_v9 = vld [vmem:[%s2658_s27 + $0x8] sm:$0xff]   ;;  %v2493_v10 = vld [vmem:[%s2658_s27 + $0x10] sm:$0xff]   ;;  %s2693_s24 = scalar_lea.vmem %s3743_s2, %s2681_s18  ;;  %s3214_s11 = scalar_lea.vmem %s3750_s9, %s2681_s18 }
  0x14   : > { %2321 = vmatprep.subr.bf16.mxu0 %v2485_v2  ;;  %2333 = vmatprep.mubr.bf16.mxu0 %v2491_v4  ;;  %v2494_v11 = vld [vmem:[%s2658_s27 + $0x18] sm:$0xff]   ;;  %v2495_v12 = vld [vmem:[%s2658_s27 + $0x20] sm:$0xff]   ;;  %v2496_v13 = vld [vmem:[%s2658_s27 + $0x28] sm:$0xff]   ;;  %s3561_s12 = scalar_lea.vmem %s3751_s10, %s2681_s18  ;;  %s3720_s20 = scalar_lea.vmem %s3749_s8, %s2681_s18 }
  0x15   : > { %v2497_v14 = vld [vmem:[%s2658_s27 + $0x30] sm:$0xff]   ;;  %v2498_v15 = vld [vmem:[%s2658_s27 + $0x38] sm:$0xff]   ;;  %v2701_v19 = vld [vmem:[%s2687_s21] sm:$0xff] }
  0x16   : > { %v2698_v18 = vld [vmem:[%s2687_s21 + $0x10] sm:$0xff]  ;;  %v2704_v21 = vld [vmem:[%s2687_s21 + $0x18] sm:$0xff]  ;;  %v2711_v25 = vld [vmem:[%s2687_s21 + $0x8] sm:$0xff] }
  0x17   : > { %2322 = vmatpush3.bf16.msra.mxu0 %v2485_v2  ;;  %v825_v22 = vld [vmem:[%s2693_s24 + $0x10] sm:$0xff]  ;;  %v823_v26 = vld [vmem:[%s2693_s24] sm:$0xff]  ;;  %v826_v29 = vld [vmem:[%s2693_s24 + $0x18] sm:$0xff] }
  0x18   : > { %2323 = vmatprep.subr.bf16.mxu0 %v2486_v3  ;;  %v824_v33 = vld [vmem:[%s2693_s24 + $0x8] sm:$0xff]  ;;  %v2742_v39 = vld [vmem:[%s2687_s21 + $0x30] sm:$0xff]  ;;  %v2750_v41 = vld [vmem:[%s2687_s21 + $0x20] sm:$0xff] }
  0x19   : > { %3766 = vst [vmem:[#allocation3_spill] sm:$0xff] %v2742_v39  ;;  %v2755_v43 = vld [vmem:[%s2687_s21 + $0x38] sm:$0xff]  ;;  %v2763_v47 = vld [vmem:[%s2687_s21 + $0x28] sm:$0xff]  ;;  %v827_v48 = vld [vmem:[%s2693_s24 + $0x20] sm:$0xff] }
  0x1a   : > { %3767 = vst [vmem:[#allocation4_spill] sm:$0xff] %v2755_v43  ;;  %v829_v52 = vld [vmem:[%s2693_s24 + $0x30] sm:$0xff]  ;;  %v828_v55 = vld [vmem:[%s2693_s24 + $0x28] sm:$0xff]  ;;  %v830_v59 = vld [vmem:[%s2693_s24 + $0x38] sm:$0xff] }
  0x1b   : > { %2324 = vmatpush3.bf16.msra.mxu0 %v2486_v3  ;;  %v2791_v61 = vld [vmem:[%s2687_s21 + $0x50] sm:$0xff]  ;;  %v2804_v0 = vld [vmem:[%s2687_s21 + $0x40] sm:$0xff]  ;;  %v2811_v3 = vld [vmem:[%s2687_s21 + $0x58] sm:$0xff] }
  0x1c   : > { %2325 = vmatprep.subr.bf16.mxu0 %v2487_v5  ;;  %3768 = vst [vmem:[#allocation5_spill] sm:$0xff] %v2791_v61  ;;  %3771 = vst [vmem:[#allocation6_spill] sm:$0xff] %v2804_v0  ;;  %v836_v63 = vld [vmem:[%s2693_s24 + $0x68] sm:$0xff] }
  0x1d   : > { %3772 = vst [vmem:[#allocation7_spill] sm:$0xff] %v2811_v3 }
  0x1f   : > { %2326 = vmatpush3.bf16.msra.mxu0 %v2487_v5 }
  0x20   : > { %2327 = vmatprep.subr.bf16.mxu0 %v2488_v6 }
  0x23   : > { %2328 = vmatpush3.bf16.msra.mxu0 %v2488_v6 }
  0x24   : > { %2329 = vmatprep.subr.bf16.mxu0 %v2489_v7 }
  0x27   : > { %2330 = vmatpush3.bf16.msra.mxu0 %v2489_v7  ;;  %v2819_v7 = vld [vmem:[%s2687_s21 + $0x48] sm:$0xff] }
  0x28   : > { %2331 = vmatprep.subr.bf16.mxu0 %v2490_v8  ;;  %3773 = vst [vmem:[#allocation8_spill] sm:$0xff] %v2819_v7 }
  0x2b   : > { %2332 = vmatpush3.bf16.msra.mxu0 %v2490_v8  ;;  %v831_v8 = vld [vmem:[%s2693_s24 + $0x40] sm:$0xff] }
  0x2e   : > { %2334 = vmatmul.mubr.bf16.vlgmr.msra.gmra.mrb[0].mxu0 %v2492_v9 }
  0x2f   : > { %2337 = vmatprep.mubr.bf16.mxu0 %v2493_v10 }
  0x36   : > { %2338 = vmatmul.mubr.bf16.gmra.mrb[4].mxu0 %v2494_v11 }
  0x37   : > { %2341 = vmatprep.mubr.bf16.mxu0 %v2495_v12  ;;  %v833_v12 = vld [vmem:[%s2693_s24 + $0x50] sm:$0xff] }
  0x3e   : > { %2342 = vmatmul.mubr.bf16.gmra.mrb[8].mxu0 %v2496_v13 }
  0x3f   : > { %2345 = vmatprep.mubr.bf16.mxu0 %v2497_v14 }
  0x46   : > { %2346 = vmatmul.mubr.bf16.gmra.mrb[12].mxu0 %v2498_v15  ;;  %v832_v15 = vld [vmem:[%s2693_s24 + $0x48] sm:$0xff] }
 0x101   : > { %v2335_v20 = vpop.f32.mrb[0].mxu0 }
 0x102   : > { %v2708_v23 = vmul.f32 %v2335_v20, %v2698_v18  ;;  %v613_v24 = vpop.f32.mrb[1].mxu0 }
 0x103   : > { %v2716_v27 = vmul.f32 %v613_v24, %v2701_v19  ;;  %v2336_v28 = vpop.f32.mrb[2].mxu0 }
 0x104   : > { %v2720_v30 = vmul.f32 %v2336_v28, %v2704_v21  ;;  %v616_v31 = vpop.f32.mrb[3].mxu0  ;;  %vm792_vm1 = vcmp.gt.f32.partialorder %v2708_v23, 0.0  ;;  %v841_v32 = vmul.f32 %v825_v22, %v2708_v23 }
 0x105   : > { %v2726_v34 = vmul.f32 %v616_v31, %v2711_v25  ;;  %vm809_vm2 = vmand %vm792_vm1, %vm806_vm0  ;;  %vm790_vm3 = vcmp.gt.f32.partialorder %v2716_v27, 0.0  ;;  %v839_v35 = vmul.f32 %v823_v26, %v2716_v27  ;;  %v834_v26 = vld [vmem:[%s2693_s24 + $0x58] sm:$0xff] }
 0x106   : > { %v2732_v36 = vsel %vm809_vm2, %v841_v32, -1.0  ;;  %vm807_vm4 = vmand %vm790_vm3, %vm806_vm0  ;;  %vm793_vm5 = vcmp.gt.f32.partialorder %v2720_v30, 0.0  ;;  %v842_v37 = vmul.f32 %v826_v29, %v2720_v30  ;;  %v2853_v29 = vld [vmem:[%s2687_s21 + $0x70] sm:$0xff] }
 0x107   : > { %875 = vmax.xlane.f32.xlu1 %v2732_v36  ;;  %v2739_v38 = vsel %vm807_vm4, %v839_v35, -1.0  ;;  %vm810_vm6 = vmand %vm793_vm5, %vm806_vm0  ;;  %vm791_vm7 = vcmp.gt.f32.partialorder %v2726_v34, 0.0  ;;  %v840_v40 = vmul.f32 %v824_v33, %v2726_v34  ;;  %3774 = vst [vmem:[#allocation9_spill] sm:$0xff] %v2853_v29  ;;  %v2866_v33 = vld [vmem:[%s2687_s21 + $0x60] sm:$0xff] }
 0x108   : > { %871 = vmax.xlane.f32.xlu0 %v2739_v38  ;;  %vm808_vm8 = vmand %vm791_vm7, %vm806_vm0  ;;  %v2760_v46 = vsel %vm810_vm6, %v842_v37, -1.0  ;;  %3777 = vst [vmem:[#allocation10_spill] sm:$0xff] %v2866_v33 }
 0x109   : > { %v2339_v42 = vpop.f32.mrb[4].mxu0  ;;  %v2770_v51 = vsel %vm808_vm8, %v840_v40, -1.0  ;;  %v2873_v40 = vld [vmem:[%s2687_s21 + $0x78] sm:$0xff] }
 0x10a   : > { %v2758_v44 = vmul.f32 %v2339_v42, %v2742_v39  ;;  %v629_v45 = vpop.f32.mrb[5].mxu0  ;;  %3778 = vst [vmem:[#allocation11_spill] sm:$0xff] %v2873_v40 }
 0x10b   : > { %v2767_v49 = vmul.f32 %v629_v45, %v2750_v41  ;;  %v2340_v50 = vpop.f32.mrb[6].mxu0  ;;  %877 = vmax.xlane.f32.xlu1 %v2760_v46 }
 0x10c   : > { %v2774_v53 = vmul.f32 %v2340_v50, %v2755_v43  ;;  %v632_v54 = vpop.f32.mrb[7].mxu0  ;;  %873 = vmax.xlane.f32.xlu0 %v2770_v51  ;;  %vm796_vm9 = vcmp.gt.f32.partialorder %v2758_v44, 0.0  ;;  %v845_v58 = vmul.f32 %v829_v52, %v2758_v44  ;;  %v2881_v50 = vld [vmem:[%s2687_s21 + $0x68] sm:$0xff]  ;;  %v835_v52 = vld [vmem:[%s2693_s24 + $0x60] sm:$0xff] }
 0x10d   : > { %v2780_v56 = vmul.f32 %v632_v54, %v2763_v47  ;;  %vm794_vm10 = vcmp.gt.f32.partialorder %v2767_v49, 0.0  ;;  %v843_v57 = vmul.f32 %v827_v48, %v2767_v49  ;;  %vm2797_vm13 = vmand %vm796_vm9, %vm806_vm0  ;;  %3779 = vst [vmem:[#allocation12_spill] sm:$0xff] %v2881_v50 }
 0x10e   : > { %vm811_vm11 = vmand %vm794_vm10, %vm806_vm0  ;;  %vm797_vm14 = vcmp.gt.f32.partialorder %v2774_v53, 0.0  ;;  %v846_v4 = vmul.f32 %v830_v59, %v2774_v53  ;;  %v2829_v11 = vsel %vm2797_vm13, %v845_v58, -1.0  ;;  %v837_v58 = vld [vmem:[%s2693_s24 + $0x70] sm:$0xff] }
 0x10f   : > { %v2788_v60 = vsel %vm811_vm11, %v843_v57, -1.0  ;;  %vm795_vm12 = vcmp.gt.f32.partialorder %v2780_v56, 0.0  ;;  %v844_v62 = vmul.f32 %v828_v55, %v2780_v56  ;;  %vm814_vm1 = vmand %vm797_vm14, %vm806_vm0 }
 0x110   : > { %879 = vmax.xlane.f32.xlu0 %v2788_v60  ;;  %vm812_vm15 = vmand %vm795_vm12, %vm806_vm0  ;;  %v2841_v20 = vsel %vm814_vm1, %v846_v4, -1.0 }
 0x111   : > { %v2343_v1 = vpop.f32.mrb[8].mxu0  ;;  %v2808_v2 = vsel %vm812_vm15, %v844_v62, -1.0 }
 0x112   : > { %v2815_v5 = vmul.f32 %v2343_v1, %v2791_v61  ;;  %v645_v6 = vpop.f32.mrb[9].mxu0  ;;  %881 = vmax.xlane.f32.xlu1 %v2808_v2 }
 0x113   : > { %v2825_v9 = vmul.f32 %v645_v6, %v2804_v0  ;;  %v2344_v10 = vpop.f32.mrb[10].mxu0 }
 0x114   : > { %v2833_v13 = vmul.f32 %v2344_v10, %v2811_v3  ;;  %v648_v14 = vpop.f32.mrb[11].mxu0  ;;  %883 = vmax.xlane.f32.xlu0 %v2829_v11  ;;  %vm800_vm2 = vcmp.gt.f32.partialorder %v2815_v5, 0.0  ;;  %v849_v24 = vmul.f32 %v833_v12, %v2815_v5  ;;  %v838_v10 = vld [vmem:[%s2693_s24 + $0x78] sm:$0xff] }
 0x115   : > { %v2839_v16 = vmul.f32 %v648_v14, %v2819_v7  ;;  %vm798_vm3 = vcmp.gt.f32.partialorder %v2825_v9, 0.0  ;;  %v847_v22 = vmul.f32 %v831_v8, %v2825_v9  ;;  %vm2859_vm6 = vmand %vm800_vm2, %vm806_vm0 }
 0x116   : > { %885 = vmax.xlane.f32.xlu1 %v2841_v20  ;;  %vm815_vm4 = vmand %vm798_vm3, %vm806_vm0  ;;  %vm801_vm7 = vcmp.gt.f32.partialorder %v2833_v13, 0.0  ;;  %v850_v42 = vmul.f32 %v834_v26, %v2833_v13  ;;  %v2891_v57 = vsel %vm2859_vm6, %v849_v24, -1.0 }
 0x117   : > { %v2850_v28 = vsel %vm815_vm4, %v847_v22, -1.0  ;;  %vm799_vm5 = vcmp.gt.f32.partialorder %v2839_v16, 0.0  ;;  %v848_v31 = vmul.f32 %v832_v15, %v2839_v16  ;;  %vm818_vm9 = vmand %vm801_vm7, %vm806_vm0 }
 0x118   : > { %887 = vmax.xlane.f32.xlu0 %v2850_v28  ;;  %vm816_vm8 = vmand %vm799_vm5, %vm806_vm0  ;;  %v2903_v4 = vsel %vm818_vm9, %v850_v42, -1.0 }
 0x119   : > { %v2347_v35 = vpop.f32.mrb[12].mxu0  ;;  %v2870_v37 = vsel %vm816_vm8, %v848_v31, -1.0 }
 0x11a   : > { %v2877_v45 = vmul.f32 %v2347_v35, %v2853_v29  ;;  %v661_v48 = vpop.f32.mrb[13].mxu0  ;;  %889 = vmax.xlane.f32.xlu1 %v2870_v37 }
 0x11b   : > { %v2887_v54 = vmul.f32 %v661_v48, %v2866_v33  ;;  %v2348_v55 = vpop.f32.mrb[14].mxu0 }
 0x11c   : > { %v2895_v59 = vmul.f32 %v2348_v55, %v2873_v40  ;;  %v664_v62 = vpop.f32.mrb[15].mxu0  ;;  %891 = vmax.xlane.f32.xlu0 %v2891_v57  ;;  %vm804_vm10 = vcmp.gt.f32.partialorder %v2877_v45, 0.0  ;;  %v853_v8 = vmul.f32 %v837_v58, %v2877_v45 }
 0x11d   : > { %v2901_v1 = vmul.f32 %v664_v62, %v2881_v50  ;;  %vm802_vm11 = vcmp.gt.f32.partialorder %v2887_v54, 0.0  ;;  %v851_v6 = vmul.f32 %v835_v52, %v2887_v54  ;;  %vm821_vm14 = vmand %vm804_vm10, %vm806_vm0 }
 0x11e   : > { %893 = vmax.xlane.f32.xlu1 %v2903_v4  ;;  %vm819_vm12 = vmand %vm802_vm11, %vm806_vm0  ;;  %vm805_vm15 = vcmp.gt.f32.partialorder %v2895_v59, 0.0  ;;  %v854_v22 = vmul.f32 %v838_v10, %v2895_v59  ;;  %v2928_v24 = vsel %vm821_vm14, %v853_v8, -1.0 }
 0x11f   : > { %3780 = vst [vmem:[#allocation13_spill] sm:$0xff] %v2901_v1  ;;  %v2912_v12 = vsel %vm819_vm12, %v851_v6, -1.0  ;;  %vm803_vm13 = vcmp.gt.f32.partialorder %v2901_v1, 0.0  ;;  %v852_v14 = vmul.f32 %v836_v63, %v2901_v1  ;;  %vm822_vm2 = vmand %vm805_vm15, %vm806_vm0 }
 0x120   : > { %895 = vmax.xlane.f32.xlu0 %v2912_v12  ;;  %vm820_vm1 = vmand %vm803_vm13, %vm806_vm0  ;;  %v2931_v26 = vsel %vm822_vm2, %v854_v22, -1.0 }
 0x121   : > { %v2922_v15 = vsel %vm820_vm1, %v852_v14, -1.0 }
 0x122   : > { %897 = vmax.xlane.f32.xlu1 %v2922_v15 }
 0x124   : > { %899 = vmax.xlane.f32.xlu0 %v2928_v24 }
 0x126   : > { %901 = vmax.xlane.f32.xlu1 %v2931_v26 }
 0x194   : > { %v876_v31 = vpop.xlane.xlu1 %875 }
 0x195   : > { %vm905_vm3 = vcmp.eq.f32.partialorder %v2732_v36, %v876_v31  ;;  %v872_v32 = vpop.xlane.xlu0 %871 }
 0x196   : > { %vm903_vm4 = vcmp.eq.f32.partialorder %v2739_v38, %v872_v32  ;;  %v2937_v35 = vsel %vm905_vm3, %v2695_v17, 128 }
 0x197   : > { %v2940_v42 = vsel %vm903_vm4, %v2695_v17, 128  ;;  %v964_v36 = vshra.s32 %v2937_v35, 16 }
 0x198   : > { %v878_v48 = vpop.xlane.xlu1 %877  ;;  %v936_v52 = vshra.s32 %v2940_v42, 16 }
 0x199   : > { %vm906_vm0 = vcmp.eq.f32.partialorder %v2760_v46, %v878_v48  ;;  %v874_v55 = vpop.xlane.xlu0 %873  ;;  %v2957_v46 = vcvt.s32.f32 %v964_v36 }
 0x19a   : > { %vm904_vm5 = vcmp.eq.f32.partialorder %v2770_v51, %v874_v55  ;;  %v2945_v58 = vcvt.s32.f32 %v936_v52  ;;  %v2949_v38 = vsel %vm906_vm0, %v2695_v17, 128 }
 0x19b   : > { %v2952_v62 = vsel %vm904_vm5, %v2695_v17, 128  ;;  %v978_v8 = vshra.s32 %v2949_v38, 16 }
 0x19c   : > { %939 = vmin.xlane.f32.xlu0 %v2945_v58  ;;  %v950_v63 = vshra.s32 %v2952_v62, 16 }
 0x19d   : > { %v880_v6 = vpop.xlane.xlu0 %879  ;;  %v2973_v32 = vcvt.s32.f32 %v978_v8 }
 0x19e   : > { %vm907_vm6 = vcmp.eq.f32.partialorder %v2788_v60, %v880_v6  ;;  %v2959_v51 = vcvt.s32.f32 %v950_v63 }
 0x19f   : > { %v2963_v10 = vsel %vm907_vm6, %v2695_v17, 128  ;;  %v882_v14 = vpop.xlane.xlu1 %881 }
 0x1a0   : > { %vm908_vm7 = vcmp.eq.f32.partialorder %v2808_v2, %v882_v14  ;;  %967 = vmin.xlane.f32.xlu0 %v2957_v46  ;;  %953 = vmin.xlane.f32.xlu1 %v2959_v51  ;;  %v992_v22 = vshra.s32 %v2963_v10, 16 }
 0x1a1   : > { %v2970_v60 = vsel %vm908_vm7, %v2695_v17, 128  ;;  %v884_v31 = vpop.xlane.xlu0 %883 }
 0x1a2   : > { %vm909_vm8 = vcmp.eq.f32.partialorder %v2829_v11, %v884_v31  ;;  %v2975_v48 = vcvt.s32.f32 %v992_v22  ;;  %v1006_v52 = vshra.s32 %v2970_v60, 16 }
 0x1a3   : > { %v2979_v2 = vsel %vm909_vm8, %v2695_v17, 128  ;;  %v886_v55 = vpop.xlane.xlu1 %885 }
 0x1a4   : > { %vm910_vm9 = vcmp.eq.f32.partialorder %v2841_v20, %v886_v55  ;;  %981 = vmin.xlane.f32.xlu1 %v2973_v32  ;;  %995 = vmin.xlane.f32.xlu0 %v2975_v48  ;;  %v1020_v36 = vshra.s32 %v2979_v2, 16  ;;  %v2989_v6 = vcvt.s32.f32 %v1006_v52 }
 0x1a5   : > { %v2986_v11 = vsel %vm910_vm9, %v2695_v17, 128  ;;  %v888_v63 = vpop.xlane.xlu0 %887 }
 0x1a6   : > { %vm911_vm10 = vcmp.eq.f32.partialorder %v2850_v28, %v888_v63  ;;  %v2991_v8 = vcvt.s32.f32 %v1020_v36  ;;  %v1034_v14 = vshra.s32 %v2986_v11, 16 }
 0x1a7   : > { %v2995_v20 = vsel %vm911_vm10, %v2695_v17, 128  ;;  %v890_v22 = vpop.xlane.xlu1 %889 }
 0x1a8   : > { %vm912_vm11 = vcmp.eq.f32.partialorder %v2870_v37, %v890_v22  ;;  %1009 = vmin.xlane.f32.xlu1 %v2989_v6  ;;  %1023 = vmin.xlane.f32.xlu0 %v2991_v8  ;;  %v1048_v31 = vshra.s32 %v2995_v20, 16  ;;  %v3005_v55 = vcvt.s32.f32 %v1034_v14 }
 0x1a9   : > { %v3002_v28 = vsel %vm912_vm11, %v2695_v17, 128  ;;  %v892_v52 = vpop.xlane.xlu0 %891 }
 0x1aa   : > { %vm913_vm12 = vcmp.eq.f32.partialorder %v2891_v57, %v892_v52  ;;  %v3007_v36 = vcvt.s32.f32 %v1048_v31  ;;  %v1062_v63 = vshra.s32 %v3002_v28, 16 }
 0x1ab   : > { %v3011_v37 = vsel %vm913_vm12, %v2695_v17, 128  ;;  %v894_v22 = vpop.xlane.xlu1 %893 }
 0x1ac   : > { %vm914_vm13 = vcmp.eq.f32.partialorder %v2903_v4, %v894_v22  ;;  %1037 = vmin.xlane.f32.xlu1 %v3005_v55  ;;  %1051 = vmin.xlane.f32.xlu0 %v3007_v36  ;;  %v1076_v40 = vshra.s32 %v3011_v37, 16  ;;  %v3021_v31 = vcvt.s32.f32 %v1062_v63 }
 0x1ad   : > { %v3018_v57 = vsel %vm914_vm13, %v2695_v17, 128  ;;  %v896_v14 = vpop.xlane.xlu0 %895 }
 0x1ae   : > { %vm915_vm14 = vcmp.eq.f32.partialorder %v2912_v12, %v896_v14  ;;  %v3023_v52 = vcvt.s32.f32 %v1076_v40  ;;  %v1090_v29 = vshra.s32 %v3018_v57, 16 }
 0x1af   : > { %v3027_v4 = vsel %vm915_vm14, %v2695_v17, 128  ;;  %v898_v22 = vpop.xlane.xlu1 %897 }
 0x1b0   : > { %vm916_vm15 = vcmp.eq.f32.partialorder %v2922_v15, %v898_v22  ;;  %1065 = vmin.xlane.f32.xlu1 %v3021_v31  ;;  %1079 = vmin.xlane.f32.xlu0 %v3023_v52  ;;  %v1104_v50 = vshra.s32 %v3027_v4, 16  ;;  %v3037_v40 = vcvt.s32.f32 %v1090_v29 }
 0x1b1   : > { %v3034_v12 = vsel %vm916_vm15, %v2695_v17, 128  ;;  %v900_v63 = vpop.xlane.xlu0 %899 }
 0x1b2   : > { %vm917_vm1 = vcmp.eq.f32.partialorder %v2928_v24, %v900_v63  ;;  %v3039_v14 = vcvt.s32.f32 %v1104_v50  ;;  %v1118_v33 = vshra.s32 %v3034_v12, 16 }
 0x1b3   : > { %v3043_v15 = vsel %vm917_vm1, %v2695_v17, 128  ;;  %v902_v22 = vpop.xlane.xlu1 %901 }
 0x1b4   : > { %vm918_vm2 = vcmp.eq.f32.partialorder %v2931_v26, %v902_v22  ;;  %1093 = vmin.xlane.f32.xlu1 %v3037_v40  ;;  %1107 = vmin.xlane.f32.xlu0 %v3039_v14  ;;  %v1132_v3 = vshra.s32 %v3043_v15, 16  ;;  %v3052_v29 = vcvt.s32.f32 %v1118_v33  ;;  %v2500_v33 = vld [vmem:[%s3746_s5 + $0x8] sm:$0xff]   ;;  %v2501_v22 = vld [vmem:[%s3746_s5 + $0x10] sm:$0xff]  }
 0x1b5   : > { %v3050_v24 = vsel %vm918_vm2, %v2695_v17, 128  ;;  %v2503_v17 = vld [vmem:[%s3746_s5 + $0x20] sm:$0xff]  }
 0x1b6   : > { %v3054_v50 = vcvt.s32.f32 %v1132_v3  ;;  %v1146_v63 = vshra.s32 %v3050_v24, 16  ;;  %v2499_v3 = vld [vmem:[%s3746_s5] sm:$0xff]  }
 0x1b7   : > { %2381 = vmatprep.subr.bf16.mxu0 %v2499_v3 }
 0x1b8   : > { %1121 = vmin.xlane.f32.xlu1 %v3052_v29  ;;  %1135 = vmin.xlane.f32.xlu0 %v3054_v50  ;;  %v3059_v26 = vcvt.s32.f32 %v1146_v63  ;;  %v2502_v63 = vld [vmem:[%s3746_s5 + $0x18] sm:$0xff]  }
 0x1b9   : > { %2382 = vmatpush3.bf16.msra.mxu0 %v2499_v3  ;;  %v963_v3 = vand.u32 65535, %v2937_v35  ;;  %v1019_v35 = vand.u32 65535, %v2979_v2 }
 0x1ba   : > { %2383 = vmatprep.subr.bf16.mxu0 %v2500_v33 }
 0x1bc   : > { %1149 = vmin.xlane.f32.xlu1 %v3059_v26  ;;  %692 = vadd.xlane.f32.xlu0 %v2716_v27 }
 0x1bd   : > { %2384 = vmatpush3.bf16.msra.mxu0 %v2500_v33  ;;  %v935_v33 = vand.u32 65535, %v2940_v42 }
 0x1be   : > { %2385 = vmatprep.subr.bf16.mxu0 %v2501_v22 }
 0x1bf   : > { %v937_v39 = vcvt.s32.f32 %v935_v33  ;;  %v1021_v33 = vcvt.s32.f32 %v1019_v35 }
 0x1c0   : > { %694 = vadd.xlane.f32.xlu1 %v2726_v34  ;;  %696 = vadd.xlane.f32.xlu0 %v2708_v23 }
 0x1c1   : > { %2386 = vmatpush3.bf16.msra.mxu0 %v2501_v22  ;;  %v965_v22 = vcvt.s32.f32 %v963_v3 }
 0x1c2   : > { %2387 = vmatprep.subr.bf16.mxu0 %v2502_v63 }
 0x1c4   : > { %698 = vadd.xlane.f32.xlu1 %v2720_v30  ;;  %700 = vadd.xlane.f32.xlu0 %v2767_v49 }
 0x1c5   : > { %2388 = vmatpush3.bf16.msra.mxu0 %v2502_v63 }
 0x1c6   : > { %2389 = vmatprep.subr.bf16.mxu0 %v2503_v17 }
 0x1c8   : > { %702 = vadd.xlane.f32.xlu1 %v2780_v56  ;;  %704 = vadd.xlane.f32.xlu0 %v2758_v44 }
 0x1c9   : > { %2390 = vmatpush3.bf16.msra.mxu0 %v2503_v17  ;;  %v949_v17 = vand.u32 65535, %v2952_v62 }
 0x1cc   : > { %706 = vadd.xlane.f32.xlu1 %v2774_v53  ;;  %708 = vadd.xlane.f32.xlu0 %v2825_v9 }
 0x1d0   : > { %710 = vadd.xlane.f32.xlu1 %v2839_v16  ;;  %712 = vadd.xlane.f32.xlu0 %v2815_v5 }
 0x1d4   : > { %714 = vadd.xlane.f32.xlu1 %v2833_v13  ;;  %716 = vadd.xlane.f32.xlu0 %v2887_v54 }
 0x1d8   : > { %718 = vadd.xlane.f32.xlu1 %v2901_v1  ;;  %v977_v1 = vand.u32 65535, %v2949_v38 }
 0x1da   : > { %v979_v63 = vcvt.s32.f32 %v977_v1  ;;  %v951_v1 = vcvt.s32.f32 %v949_v17 }
 0x229   : > { %v3092_v61 = vpop.xlane.xlu0 %939 }
 0x22a   : > { %vm941_vm4 = vcmp.eq.f32.partialorder %v2945_v58, %v3092_v61  ;;  %v1033_v58 = vand.u32 65535, %v2986_v11 }
 0x22c   : > { %v1035_v17 = vcvt.s32.f32 %v1033_v58 }
 0x22d   : > { %v3096_v7 = vpop.xlane.xlu1 %953  ;;  %v3098_v0 = vpop.xlane.xlu0 %967 }
 0x22e   : > { %vm969_vm3 = vcmp.eq.f32.partialorder %v2957_v46, %v3098_v0  ;;  %v942_v46 = vsel %vm941_vm4, %v937_v39, inf  ;;  %vm955_vm5 = vcmp.eq.f32.partialorder %v2959_v51, %v3096_v7  ;;  %v1005_v51 = vand.u32 65535, %v2970_v60 }
 0x22f   : > { %v970_v43 = vsel %vm969_vm3, %v965_v22, inf  ;;  %v1047_v60 = vand.u32 65535, %v2995_v20  ;;  %v1061_v20 = vand.u32 65535, %v3002_v28  ;;  %v2505_v28 = vld [vmem:[%s3746_s5 + $0x30] sm:$0xff]  }
 0x230   : > { %971 = vmin.xlane.f32.xlu0 %v970_v43  ;;  %v991_v43 = vand.u32 65535, %v2963_v10  ;;  %v1075_v10 = vand.u32 65535, %v3011_v37 }
 0x231   : > { %v3106_v42 = vpop.xlane.xlu1 %981  ;;  %v3108_v38 = vpop.xlane.xlu0 %995 }
 0x232   : > { %vm983_vm0 = vcmp.eq.f32.partialorder %v2973_v32, %v3106_v42  ;;  %v956_v32 = vsel %vm955_vm5, %v951_v1, inf  ;;  %vm997_vm7 = vcmp.eq.f32.partialorder %v2975_v48, %v3108_v38  ;;  %v993_v35 = vcvt.s32.f32 %v991_v43 }
 0x233   : > { %v984_v3 = vsel %vm983_vm0, %v979_v63, inf  ;;  %v1089_v48 = vand.u32 65535, %v3018_v57  ;;  %v1077_v43 = vcvt.s32.f32 %v1075_v10  ;;  %v1131_v57 = vand.u32 65535, %v3043_v15 }
 0x234   : > { %985 = vmin.xlane.f32.xlu1 %v984_v3  ;;  %943 = vmin.xlane.f32.xlu0 %v942_v46  ;;  %v998_v63 = vsel %vm997_vm7, %v993_v35, inf  ;;  %v1007_v46 = vcvt.s32.f32 %v1005_v51  ;;  %v1103_v15 = vand.u32 65535, %v3027_v4  ;;  %v1145_v51 = vand.u32 65535, %v3050_v24 }
 0x235   : > { %v3116_v62 = vpop.xlane.xlu1 %1009  ;;  %v3118_v2 = vpop.xlane.xlu0 %1023  ;;  %v1133_v35 = vcvt.s32.f32 %v1131_v57  ;;  %v1117_v4 = vand.u32 65535, %v3034_v12 }
 0x236   : > { %vm1025_vm6 = vcmp.eq.f32.partialorder %v2991_v8, %v3118_v2  ;;  %vm1011_vm9 = vcmp.eq.f32.partialorder %v2989_v6, %v3116_v62  ;;  %v2504_v6 = vld [vmem:[%s3746_s5 + $0x28] sm:$0xff]  }
 0x237   : > { %v1026_v39 = vsel %vm1025_vm6, %v1021_v33, inf  ;;  %2391 = vmatprep.subr.bf16.mxu0 %v2504_v6 }
 0x238   : > { %957 = vmin.xlane.f32.xlu1 %v956_v32  ;;  %1027 = vmin.xlane.f32.xlu0 %v1026_v39  ;;  %v1049_v32 = vcvt.s32.f32 %v1047_v60  ;;  %v1147_v60 = vcvt.s32.f32 %v1145_v51 }
 0x239   : > { %v3126_v11 = vpop.xlane.xlu1 %1037  ;;  %v3128_v22 = vpop.xlane.xlu0 %1051  ;;  %2392 = vmatpush3.bf16.msra.mxu0 %v2504_v6  ;;  %v1119_v6 = vcvt.s32.f32 %v1117_v4  ;;  %v2510_v4 = vld [vmem:[%s3745_s4 + $0x18] sm:$0xff]  }
 0x23a   : > { %vm1039_vm8 = vcmp.eq.f32.partialorder %v3005_v55, %v3126_v11  ;;  %v1012_v55 = vsel %vm1011_vm9, %v1007_v46, inf  ;;  %vm1053_vm11 = vcmp.eq.f32.partialorder %v3007_v36, %v3128_v22  ;;  %2393 = vmatprep.subr.bf16.mxu0 %v2505_v28 }
 0x23b   : > { %v1040_v8 = vsel %vm1039_vm8, %v1035_v17, inf  ;;  %v1054_v36 = vsel %vm1053_vm11, %v1049_v32, inf  ;;  %v1063_v17 = vcvt.s32.f32 %v1061_v20 }
 0x23c   : > { %1041 = vmin.xlane.f32.xlu1 %v1040_v8  ;;  %999 = vmin.xlane.f32.xlu0 %v998_v63 }
 0x23d   : > { %v3136_v37 = vpop.xlane.xlu1 %1065  ;;  %v3138_v3 = vpop.xlane.xlu0 %1079  ;;  %2394 = vmatpush3.bf16.msra.mxu0 %v2505_v28  ;;  %v2509_v28 = vld [vmem:[%s3745_s4 + $0x10] sm:$0xff]  }
 0x23e   : > { %vm1081_vm10 = vcmp.eq.f32.partialorder %v3023_v52, %v3138_v3  ;;  %v1091_v52 = vcvt.s32.f32 %v1089_v48  ;;  %vm1067_vm13 = vcmp.eq.f32.partialorder %v3021_v31, %v3136_v37  ;;  %v1105_v48 = vcvt.s32.f32 %v1103_v15 }
 0x23f   : > { %v1082_v58 = vsel %vm1081_vm10, %v1077_v43, inf  ;;  %v1068_v8 = vsel %vm1067_vm13, %v1063_v17, inf }
 0x240   : > { %1013 = vmin.xlane.f32.xlu1 %v1012_v55  ;;  %1083 = vmin.xlane.f32.xlu0 %v1082_v58 }
 0x241   : > { %v3149_v1 = vpop.xlane.xlu1 %1093  ;;  %v3151_v33 = vpop.xlane.xlu0 %1107 }
 0x242   : > { %vm1095_vm12 = vcmp.eq.f32.partialorder %v3037_v40, %v3149_v1  ;;  %vm1109_vm15 = vcmp.eq.f32.partialorder %v3039_v14, %v3151_v33  ;;  %v2507_v14 = vld [vmem:[%s3745_s4] sm:$0xff]  }
 0x243   : > { %v1096_v39 = vsel %vm1095_vm12, %v1091_v52, inf  ;;  %v1110_v43 = vsel %vm1109_vm15, %v1105_v48, inf  ;;  %2349 = vmatprep.subr.bf16.mxu1 %v2507_v14  ;;  %v2508_v52 = vld [vmem:[%s3745_s4 + $0x8] sm:$0xff]  }
 0x244   : > { %1097 = vmin.xlane.f32.xlu1 %v1096_v39  ;;  %1055 = vmin.xlane.f32.xlu0 %v1054_v36 }
 0x245   : > { %v3162_v10 = vpop.xlane.xlu1 %1121  ;;  %v3164_v40 = vpop.xlane.xlu0 %1135  ;;  %2350 = vmatpush3.bf16.msra.mxu1 %v2507_v14 }
 0x246   : > { %vm1137_vm14 = vcmp.eq.f32.partialorder %v3054_v50, %v3164_v40  ;;  %v2506_v50 = vld [vmem:[%s3746_s5 + $0x38] sm:$0xff]   ;;  %vm1123_vm2 = vcmp.eq.f32.partialorder %v3052_v29, %v3162_v10  ;;  %2351 = vmatprep.subr.bf16.mxu1 %v2508_v52 }
 0x247   : > { %v1138_v31 = vsel %vm1137_vm14, %v1133_v35, inf  ;;  %2395 = vmatprep.subr.bf16.mxu0 %v2506_v50  ;;  %v1124_v57 = vsel %vm1123_vm2, %v1119_v6, inf }
 0x248   : > { %1069 = vmin.xlane.f32.xlu1 %v1068_v8  ;;  %1139 = vmin.xlane.f32.xlu0 %v1138_v31 }
 0x249   : > { %v3171_v24 = vpop.xlane.xlu1 %1149  ;;  %v3173_v63 = vpop.xlane.xlu0 %692  ;;  %2396 = vmatpush3.bf16.msra.mxu0 %v2506_v50  ;;  %2352 = vmatpush3.bf16.msra.mxu1 %v2508_v52 }
 0x24a   : > { %v724_v46 = vmax.f32 %v3173_v63, 1e-30  ;;  %vm1151_vm1 = vcmp.eq.f32.partialorder %v3059_v26, %v3171_v24  ;;  %2353 = vmatprep.subr.bf16.mxu1 %v2509_v28  ;;  %vm1159_vm0 = vcmp.gt.f32.partialorder %v3173_v63, 0.0 }
 0x24b   : > { %v1152_v12 = vsel %vm1151_vm1, %v1147_v60, inf }
 0x24c   : > { %2519 = vrcp.f32 %v724_v46  ;;  %1153 = vmin.xlane.f32.xlu1 %v1152_v12  ;;  %1111 = vmin.xlane.f32.xlu0 %v1110_v43  ;;  %v2511_v43 = vld [vmem:[%s3745_s4 + $0x20] sm:$0xff]  }
 0x24d   : > { %v3186_v55 = vpop.xlane.xlu1 %694  ;;  %v3188_v58 = vpop.xlane.xlu0 %696  ;;  %2354 = vmatpush3.bf16.msra.mxu1 %v2509_v28 }
 0x24e   : > { %v725_v26 = vmax.f32 %v3186_v55, 1e-30  ;;  %v726_v20 = vmax.f32 %v3188_v58, 1e-30  ;;  %2355 = vmatprep.subr.bf16.mxu1 %v2510_v4  ;;  %vm1161_vm3 = vcmp.gt.f32.partialorder %v3188_v58, 0.0  ;;  %vm1160_vm9 = vcmp.gt.f32.partialorder %v3186_v55, 0.0 }
 0x250   : > { %2521 = vrcp.f32 %v725_v26  ;;  %1125 = vmin.xlane.f32.xlu1 %v1124_v57  ;;  %720 = vadd.xlane.f32.xlu0 %v2877_v45 }
 0x251   : > { %2523 = vrcp.f32 %v726_v20  ;;  %v3196_v29 = vpop.xlane.xlu1 %698  ;;  %v3198_v32 = vpop.xlane.xlu0 %700  ;;  %2356 = vmatpush3.bf16.msra.mxu1 %v2510_v4 }
 0x252   : > { %v727_v39 = vmax.f32 %v3196_v29, 1e-30  ;;  %v728_v36 = vmax.f32 %v3198_v32, 1e-30  ;;  %2357 = vmatprep.subr.bf16.mxu1 %v2511_v43  ;;  %vm1162_vm5 = vcmp.gt.f32.partialorder %v3196_v29, 0.0  ;;  %vm1163_vm14 = vcmp.gt.f32.partialorder %v3198_v32, 0.0 }
 0x254   : > { %2525 = vrcp.f32 %v727_v39  ;;  %722 = vadd.xlane.f32.xlu1 %v2895_v59 }
 0x255   : > { %2527 = vrcp.f32 %v728_v36  ;;  %v3206_v15 = vpop.xlane.xlu1 %702  ;;  %v3208_v51 = vpop.xlane.xlu0 %704  ;;  %2358 = vmatpush3.bf16.msra.mxu1 %v2511_v43  ;;  %v2512_v36 = vld [vmem:[%s3745_s4 + $0x28] sm:$0xff]  }
 0x256   : > { %v2520_v17 = vpop.eup %2519  ;;  %v729_v35 = vmax.f32 %v3206_v15, 1e-30  ;;  %v730_v8 = vmax.f32 %v3208_v51, 1e-30  ;;  %2359 = vmatprep.subr.bf16.mxu1 %v2512_v36  ;;  %vm1165_vm10 = vcmp.gt.f32.partialorder %v3208_v51, 0.0 }
 0x257   : > { %v741_v31 = vmul.f32 %v2520_v17, %v2716_v27 }
 0x258   : > { %2529 = vrcp.f32 %v729_v35 }
 0x259   : > { %772 = vst [vmem:[%s3214_s11] sm:$0xff] %v741_v31  ;;  %2531 = vrcp.f32 %v730_v8  ;;  %v3223_v60 = vpop.xlane.xlu1 %706  ;;  %v3225_v48 = vpop.xlane.xlu0 %708  ;;  %2360 = vmatpush3.bf16.msra.mxu1 %v2512_v36 }
 0x25a   : > { %v2522_v50 = vpop.eup %2521  ;;  %v731_v46 = vmax.f32 %v3223_v60, 1e-30  ;;  %v732_v14 = vmax.f32 %v3225_v48, 1e-30  ;;  %vm1166_vm15 = vcmp.gt.f32.partialorder %v3223_v60, 0.0  ;;  %v1072_v60 = vcvt.f32.s32 %v3136_v37 }
 0x25b   : > { %v2524_v27 = vpop.eup %2523  ;;  %v743_v12 = vmul.f32 %v2522_v50, %v2726_v34  ;;  %v2513_v50 = vld [vmem:[%s3745_s4 + $0x30] sm:$0xff]  }
 0x25c   : > { %v745_v6 = vmul.f32 %v2524_v27, %v2708_v23  ;;  %2533 = vrcp.f32 %v731_v46  ;;  %2361 = vmatprep.subr.bf16.mxu1 %v2513_v50 }
 0x25d   : > { %773 = vst [vmem:[%s3214_s11 + $0x8] sm:$0xff] %v743_v12  ;;  %2535 = vrcp.f32 %v732_v14  ;;  %v3235_v26 = vpop.xlane.xlu1 %710  ;;  %v3237_v20 = vpop.xlane.xlu0 %712  ;;  %2362 = vmatpush3.bf16.msra.mxu1 %v2513_v50 }
 0x25e   : > { %v2526_v57 = vpop.eup %2525  ;;  %774 = vst [vmem:[%s3214_s11 + $0x10] sm:$0xff] %v745_v6  ;;  %v733_v34 = vmax.f32 %v3235_v26, 1e-30  ;;  %v734_v52 = vmax.f32 %v3237_v20, 1e-30 }
 0x25f   : > { %v2528_v39 = vpop.eup %2527  ;;  %v747_v23 = vmul.f32 %v2526_v57, %v2720_v30  ;;  %v1287_v57 = vpack.c.bf16 %v2711_v25, %v2701_v19 }
 0x260   : > { %v749_v28 = vmul.f32 %v2528_v39, %v2767_v49  ;;  %2537 = vrcp.f32 %v733_v34 }
 0x261   : > { %775 = vst [vmem:[%s3214_s11 + $0x18] sm:$0xff] %v747_v23  ;;  %2539 = vrcp.f32 %v734_v52  ;;  %v3248_v17 = vpop.xlane.xlu1 %714  ;;  %v3250_v35 = vpop.xlane.xlu0 %716  ;;  %v1288_v52 = vpack.c.bf16 %v2704_v21, %v2698_v18  ;;  %2365 = vmatprep.mubr.bf16.mxu1 %v1287_v57  ;;  %v1289_v18 = vpack.c.bf16 %v2763_v47, %v2750_v41  ;;  %v3781_v21 = vld [vmem:[#allocation3_spill] sm:$0xff]  ;;  %v3790_v47 = vld [vmem:[#allocation9_spill] sm:$0xff] }
 0x262   : > { %v2530_v8 = vpop.eup %2529  ;;  %776 = vst [vmem:[%s3214_s11 + $0x20] sm:$0xff] %v749_v28  ;;  %v735_v30 = vmax.f32 %v3248_v17, 1e-30  ;;  %v736_v31 = vmax.f32 %v3250_v35, 1e-30  ;;  %v3782_v28 = vld [vmem:[#allocation4_spill] sm:$0xff] }
 0x263   : > { %v2532_v4 = vpop.eup %2531  ;;  %v751_v49 = vmul.f32 %v2530_v8, %v2780_v56  ;;  %v2514_v56 = vld [vmem:[%s3745_s4 + $0x38] sm:$0xff]  }
 0x264   : > { %v753_v46 = vmul.f32 %v2532_v4, %v2758_v44  ;;  %2541 = vrcp.f32 %v735_v30  ;;  %2363 = vmatprep.subr.bf16.mxu1 %v2514_v56  ;;  %v3784_v30 = vld [vmem:[#allocation8_spill] sm:$0xff]  ;;  %v3785_v4 = vld [vmem:[#allocation13_spill] sm:$0xff] }
 0x265   : > { %777 = vst [vmem:[%s3214_s11 + $0x28] sm:$0xff] %v751_v49  ;;  %2543 = vrcp.f32 %v736_v31  ;;  %v3261_v14 = vpop.xlane.xlu1 %718  ;;  %2364 = vmatpush3.bf16.msra.mxu1 %v2514_v56 }
 0x266   : > { %v2534_v27 = vpop.eup %2533  ;;  %778 = vst [vmem:[%s3214_s11 + $0x30] sm:$0xff] %v753_v46  ;;  %v737_v12 = vmax.f32 %v3261_v14, 1e-30  ;;  %v3788_v46 = vld [vmem:[#allocation10_spill] sm:$0xff] }
 0x267   : > { %v2536_v43 = vpop.eup %2535  ;;  %v755_v44 = vmul.f32 %v2534_v27, %v2774_v53  ;;  %v3789_v27 = vld [vmem:[#allocation12_spill] sm:$0xff] }
 0x268   : > { %v757_v6 = vmul.f32 %v2536_v43, %v2825_v9  ;;  %2545 = vrcp.f32 %v737_v12  ;;  %2366 = vmatmul.mubr.bf16.vlgmr.msra.gmra.mrb[0].mxu1 %v1288_v52  ;;  %v1293_v41 = vpack.c.bf16 %v3789_v27, %v3788_v46  ;;  %v3791_v12 = vld [vmem:[#allocation11_spill] sm:$0xff]  ;;  %v974_v43 = vcvt.f32.s32 %v3098_v0 }
 0x269   : > { %779 = vst [vmem:[%s3214_s11 + $0x38] sm:$0xff] %v755_v44  ;;  %2369 = vmatprep.mubr.bf16.mxu1 %v1289_v18  ;;  %v1294_v56 = vpack.c.bf16 %v3791_v12, %v3790_v47  ;;  %v946_v44 = vcvt.f32.s32 %v3092_v61  ;;  %v988_v52 = vcvt.f32.s32 %v3106_v42  ;;  %v1058_v61 = vcvt.f32.s32 %v3128_v22 }
 0x26a   : > { %v2538_v34 = vpop.eup %2537  ;;  %780 = vst [vmem:[%s3214_s11 + $0x40] sm:$0xff] %v757_v6  ;;  %v960_v6 = vcvt.f32.s32 %v3096_v7  ;;  %v1086_v47 = vcvt.f32.s32 %v3138_v3 }
 0x26b   : > { %v2540_v39 = vpop.eup %2539  ;;  %v759_v53 = vmul.f32 %v2538_v34, %v2839_v16  ;;  %v1290_v16 = vpack.c.bf16 %v3782_v28, %v3781_v21  ;;  %v975_v34 = vshll.u32 %v974_v43, 16  ;;  %v989_v21 = vshll.u32 %v988_v52, 16 }
 0x26c   : > { %v761_v9 = vmul.f32 %v2540_v39, %v2815_v5  ;;  %v3783_v5 = vld [vmem:[#allocation6_spill] sm:$0xff]  ;;  %v961_v0 = vshll.u32 %v960_v6, 16  ;;  %v2552_v6 = vld [vmem:[%s2687_s21 + $0x18] sm:$0xff] }
 0x26d   : > { %781 = vst [vmem:[%s3214_s11 + $0x48] sm:$0xff] %v759_v53  ;;  %v1291_v31 = vpack.c.bf16 %v3784_v30, %v3783_v5  ;;  %v1002_v53 = vcvt.f32.s32 %v3108_v38  ;;  %v2575_v30 = vmov 0.0  }
 0x26e   : > { %v2542_v23 = vpop.eup %2541  ;;  %782 = vst [vmem:[%s3214_s11 + $0x50] sm:$0xff] %v761_v9  ;;  %v1016_v9 = vcvt.f32.s32 %v3116_v62 }
 0x26f   : > { %v2544_v19 = vpop.eup %2543  ;;  %v763_v25 = vmul.f32 %v2542_v23, %v2833_v13  ;;  %v3786_v13 = vld [vmem:[#allocation5_spill] sm:$0xff]  ;;  %v1030_v23 = vcvt.f32.s32 %v3118_v2  ;;  %v1003_v62 = vshll.u32 %v1002_v53, 16 }
 0x270   : > { %v765_v36 = vmul.f32 %v2544_v19, %v2887_v54  ;;  %2370 = vmatmul.mubr.bf16.gmra.mrb[4].mxu1 %v1290_v16  ;;  %v3787_v54 = vld [vmem:[#allocation7_spill] sm:$0xff]  ;;  %v947_v19 = vshll.u32 %v946_v44, 16  ;;  %v3310_v16 = vshll.u32 %v1016_v9, 16 }
 0x271   : > { %783 = vst [vmem:[%s3214_s11 + $0x58] sm:$0xff] %v763_v25  ;;  %2373 = vmatprep.mubr.bf16.mxu1 %v1291_v31  ;;  %v1292_v50 = vpack.c.bf16 %v3787_v54, %v3786_v13  ;;  %v1044_v25 = vcvt.f32.s32 %v3126_v11  ;;  %v1031_v2 = vshll.u32 %v1030_v23, 16  ;;  %v3792_v11 = vld [vmem:[#allocation2_spill] sm:$0xff]  ;;  %v3318_v31 = vshll.u32 %v1058_v61, 16  ;;  %v2551_v13 = vld [vmem:[%s2687_s21 + $0x10] sm:$0xff] }
 0x272   : > { %v2546_v8 = vpop.eup %2545  ;;  %784 = vst [vmem:[%s3214_s11 + $0x60] sm:$0xff] %v765_v36  ;;  %v2576_v61 = vmov 1.0|1.0  }
 0x273   : > { %v767_v49 = vmul.f32 %v2546_v8, %v3785_v4  ;;  %v1045_v8 = vshll.u32 %v1044_v25, 16  ;;  %v1100_v25 = vcvt.f32.s32 %v3149_v1 }
 0x275   : > { %785 = vst [vmem:[%s3214_s11 + $0x68] sm:$0xff] %v767_v49 }
 0x278   : > { %2374 = vmatmul.mubr.bf16.gmra.mrb[8].mxu1 %v1292_v50 }
 0x279   : > { %2377 = vmatprep.mubr.bf16.mxu1 %v1293_v41 }
 0x280   : > { %2378 = vmatmul.mubr.bf16.gmra.mrb[12].mxu1 %v1294_v56 }
 0x2bd   : > { %v972_v57 = vpop.xlane.xlu0 %971 }
 0x2be   : > { %v973_v39 = vcvt.f32.s32 %v972_v57 }
 0x2c0   : > { %v976_v36 = vadd.s32 %v975_v34, %v973_v39  ;;  %v2553_v34 = vld [vmem:[%s2687_s21] sm:$0xff] }
 0x2c1   : > { %v986_v7 = vpop.xlane.xlu1 %985  ;;  %v944_v18 = vpop.xlane.xlu0 %943 }
 0x2c2   : > { %v987_v42 = vcvt.f32.s32 %v986_v7  ;;  %v945_v28 = vcvt.f32.s32 %v944_v18  ;;  %v3308_v38 = vsel %vm1161_vm3, %v976_v36, 0  ;;  %v2554_v18 = vld [vmem:[%s2687_s21 + $0x8] sm:$0xff] }
 0x2c3   : > { %vm1193_vm4 = vcmp.eq.s32.totalorder %v3792_v11, %v3308_v38 }
 0x2c4   : > { %v990_v5 = vadd.s32 %v989_v21, %v987_v42  ;;  %v948_v22 = vadd.s32 %v947_v19, %v945_v28  ;;  %v2181_v58 = vsel %vm1193_vm4, 1.0, %v2575_v30  ;;  %v1087_v19 = vshll.u32 %v1086_v47, 16  ;;  %v2555_v42 = vld [vmem:[%s2687_s21 + $0x30] sm:$0xff] }
 0x2c5   : > { %v958_v4 = vpop.xlane.xlu1 %957  ;;  %v1028_v49 = vpop.xlane.xlu0 %1027  ;;  %v1241_v54 = vmul.f32 %v2551_v13, %v2181_v58 }
 0x2c6   : > { %v959_v50 = vcvt.f32.s32 %v958_v4  ;;  %v1029_v46 = vcvt.f32.s32 %v1028_v49  ;;  %v3323_v27 = vsel %vm1162_vm5, %v990_v5, 0  ;;  %v3325_v41 = vsel %vm1159_vm0, %v948_v22, 0 }
 0x2c7   : > { %1259 = vadd.xlane.f32.xlu0 %v1241_v54  ;;  %vm1194_vm6 = vcmp.eq.s32.totalorder %v3792_v11, %v3323_v27  ;;  %vm1191_vm7 = vcmp.eq.s32.totalorder %v3792_v11, %v3325_v41  ;;  %v1101_v5 = vshll.u32 %v1100_v25, 16  ;;  %vm1169_vm0 = vcmp.gt.f32.partialorder %v3237_v20, 0.0  ;;  %v2556_v54 = vld [vmem:[%s2687_s21 + $0x38] sm:$0xff] }
 0x2c8   : > { %v962_v63 = vadd.s32 %v961_v0, %v959_v50  ;;  %v1032_v29 = vadd.s32 %v1031_v2, %v1029_v46  ;;  %v2182_v12 = vsel %vm1194_vm6, 1.0, %v2575_v30  ;;  %vm3336_vm8 = vmpackc.low %vm1194_vm6, %vm1193_vm4  ;;  %v2179_v3 = vsel %vm1191_vm7, 1.0, %v2575_v30  ;;  %v2557_v46 = vld [vmem:[%s2687_s21 + $0x20] sm:$0xff] }
 0x2c9   : > { %v1042_v43 = vpop.xlane.xlu1 %1041  ;;  %v1000_v44 = vpop.xlane.xlu0 %999  ;;  %v1242_v57 = vmul.f32 %v2552_v6, %v2182_v12  ;;  %v1239_v52 = vmul.f32 %v2553_v34, %v2179_v3  ;;  %vm1164_vm4 = vcmp.gt.f32.partialorder %v3206_v15, 0.0  ;;  %v1073_v3 = vshll.u32 %v1072_v60, 16 }
 0x2ca   : > { %v3348_v39 = vsel %vm1160_vm9, %v962_v63, 0  ;;  %v1043_v53 = vcvt.f32.s32 %v1042_v43  ;;  %v1001_v9 = vcvt.f32.s32 %v1000_v44  ;;  %v3350_v23 = vsel %vm1165_vm10, %v1032_v29, 0 }
 0x2cb   : > { %1261 = vadd.xlane.f32.xlu1 %v1242_v57  ;;  %1255 = vadd.xlane.f32.xlu0 %v1239_v52  ;;  %vm1192_vm11 = vcmp.eq.s32.totalorder %v3792_v11, %v3348_v39  ;;  %vm1197_vm12 = vcmp.eq.s32.totalorder %v3792_v11, %v3350_v23  ;;  %vm1170_vm9 = vcmp.gt.f32.partialorder %v3248_v17, 0.0  ;;  %v2559_v52 = vld [vmem:[%s2687_s21 + $0x50] sm:$0xff]  ;;  %v1142_v17 = vcvt.f32.s32 %v3164_v40 }
 0x2cc   : > { %v1046_v55 = vadd.s32 %v1045_v8, %v1043_v53  ;;  %v1004_v51 = vadd.s32 %v1003_v62, %v1001_v9  ;;  %vm2211_vm13 = vmpackc.low %vm1192_vm11, %vm1191_vm7  ;;  %v2180_v36 = vsel %vm1192_vm11, 1.0, %v2575_v30  ;;  %v2185_v1 = vsel %vm1197_vm12, 1.0, %v2575_v30 }
 0x2cd   : > { %v1014_v0 = vpop.xlane.xlu1 %1013  ;;  %2397 = vmatprep.mubr.msk.bf16.mxu0 %vm2211_vm13, %v2576_v61  ;;  %v1084_v7 = vpop.xlane.xlu0 %1083  ;;  %v1240_v21 = vmul.f32 %v2554_v18, %v2180_v36  ;;  %v1245_v28 = vmul.f32 %v2555_v42, %v2185_v1  ;;  %v1114_v9 = vcvt.f32.s32 %v3151_v33  ;;  %v1128_v33 = vcvt.f32.s32 %v3162_v10 }
 0x2ce   : > { %v1015_v62 = vcvt.f32.s32 %v1014_v0  ;;  %v1085_v2 = vcvt.f32.s32 %v1084_v7  ;;  %2398 = vmatmul.mubr.msk.bf16.vlgmr.msra.gmra.mrb[16].mxu0 %vm3336_vm8, %v2576_v61  ;;  %v3373_v8 = vsel %vm1166_vm15, %v1046_v55, 0  ;;  %v3375_v32 = vsel %vm1163_vm14, %v1004_v51, 0  ;;  %v2560_v7 = vld [vmem:[%s2687_s21 + $0x58] sm:$0xff] }
 0x2cf   : > { %1257 = vadd.xlane.f32.xlu1 %v1240_v21  ;;  %1267 = vadd.xlane.f32.xlu0 %v1245_v28  ;;  %vm1198_vm1 = vcmp.eq.s32.totalorder %v3792_v11, %v3373_v8  ;;  %vm1195_vm2 = vcmp.eq.s32.totalorder %v3792_v11, %v3375_v32  ;;  %vm1167_vm8 = vcmp.gt.f32.partialorder %v3225_v48, 0.0  ;;  %vm1168_vm13 = vcmp.gt.f32.partialorder %v3235_v26, 0.0  ;;  %v2561_v21 = vld [vmem:[%s2687_s21 + $0x40] sm:$0xff] }
 0x2d0   : > { %v1018_v22 = vadd.s32 %v3310_v16, %v1015_v62  ;;  %v1088_v58 = vadd.s32 %v1087_v19, %v1085_v2  ;;  %v2186_v4 = vsel %vm1198_vm1, 1.0, %v2575_v30  ;;  %v2183_v37 = vsel %vm1195_vm2, 1.0, %v2575_v30  ;;  %vm3391_vm3 = vmpackc.low %vm1198_vm1, %vm1197_vm12 }
 0x2d1   : > { %v1098_v16 = vpop.xlane.xlu1 %1097  ;;  %v1056_v13 = vpop.xlane.xlu0 %1055  ;;  %v1246_v50 = vmul.f32 %v2556_v54, %v2186_v4  ;;  %v1243_v47 = vmul.f32 %v2557_v46, %v2183_v37  ;;  %v1115_v28 = vshll.u32 %v1114_v9, 16  ;;  %v1143_v60 = vshll.u32 %v1142_v17, 16  ;;  %v2566_v17 = vld [vmem:[%s2687_s21 + $0x78] sm:$0xff] }
 0x2d2   : > { %v3399_v63 = vsel %vm1164_vm4, %v1018_v22, 0  ;;  %v1099_v29 = vcvt.f32.s32 %v1098_v16  ;;  %v1057_v12 = vcvt.f32.s32 %v1056_v13  ;;  %v3401_v56 = vsel %vm1169_vm0, %v1088_v58, 0  ;;  %v2562_v16 = vld [vmem:[%s2687_s21 + $0x48] sm:$0xff] }
 0x2d3   : > { %1269 = vadd.xlane.f32.xlu1 %v1246_v50  ;;  %1263 = vadd.xlane.f32.xlu0 %v1243_v47  ;;  %vm1196_vm5 = vcmp.eq.s32.totalorder %v3792_v11, %v3399_v63  ;;  %vm1201_vm6 = vcmp.eq.s32.totalorder %v3792_v11, %v3401_v56  ;;  %v1129_v26 = vshll.u32 %v1128_v33, 16  ;;  %vm1171_vm1 = vcmp.gt.f32.partialorder %v3250_v35, 0.0 }
 0x2d4   : > { %v1102_v15 = vadd.s32 %v1101_v5, %v1099_v29  ;;  %v1060_v20 = vadd.s32 %v3318_v31, %v1057_v12  ;;  %vm2215_vm7 = vmpackc.low %vm1196_vm5, %vm1195_vm2  ;;  %v2184_v43 = vsel %vm1196_vm5, 1.0, %v2575_v30  ;;  %v2189_v44 = vsel %vm1201_vm6, 1.0, %v2575_v30  ;;  %v2558_v31 = vld [vmem:[%s2687_s21 + $0x28] sm:$0xff] }
 0x2d5   : > { %v1070_v6 = vpop.xlane.xlu1 %1069  ;;  %2401 = vmatprep.mubr.msk.bf16.mxu0 %vm2215_vm7, %v2576_v61  ;;  %v1140_v57 = vpop.xlane.xlu0 %1139  ;;  %v1244_v34 = vmul.f32 %v2558_v31, %v2184_v43  ;;  %v1249_v53 = vmul.f32 %v2559_v52, %v2189_v44  ;;  %v1156_v5 = vcvt.f32.s32 %v3171_v24  ;;  %vm1172_vm0 = vcmp.gt.f32.partialorder %v3261_v14, 0.0  ;;  %v2563_v44 = vld [vmem:[%s2687_s21 + $0x60] sm:$0xff] }
 0x2d6   : > { %v1071_v19 = vcvt.f32.s32 %v1070_v6  ;;  %2402 = vmatmul.mubr.msk.bf16.gmra.mrb[20].mxu0 %vm3391_vm3, %v2576_v61  ;;  %v3425_v25 = vsel %vm1170_vm9, %v1102_v15, 0  ;;  %v3427_v48 = vsel %vm1167_vm8, %v1060_v20, 0  ;;  %v1141_v1 = vcvt.f32.s32 %v1140_v57 }
 0x2d7   : > { %1265 = vadd.xlane.f32.xlu1 %v1244_v34  ;;  %1275 = vadd.xlane.f32.xlu0 %v1249_v53  ;;  %vm1202_vm10 = vcmp.eq.s32.totalorder %v3792_v11, %v3425_v25  ;;  %vm1199_vm11 = vcmp.eq.s32.totalorder %v3792_v11, %v3427_v48  ;;  %v1157_v47 = vshll.u32 %v1156_v5, 16  ;;  %v2564_v34 = vld [vmem:[%s2687_s21 + $0x68] sm:$0xff]  ;;  %v2565_v53 = vld [vmem:[%s2687_s21 + $0x70] sm:$0xff] }
 0x2d8   : > { %v1074_v55 = vadd.s32 %v1073_v3, %v1071_v19  ;;  %v2190_v51 = vsel %vm1202_vm10, 1.0, %v2575_v30  ;;  %v2187_v36 = vsel %vm1199_vm11, 1.0, %v2575_v30  ;;  %vm3443_vm12 = vmpackc.low %vm1202_vm10, %vm1201_vm6  ;;  %v1144_v4 = vadd.s32 %v1143_v60, %v1141_v1 }
 0x2d9   : > { %v1154_v0 = vpop.xlane.xlu1 %1153  ;;  %v1112_v10 = vpop.xlane.xlu0 %1111  ;;  %v1250_v18 = vmul.f32 %v2560_v7, %v2190_v51  ;;  %v1247_v42 = vmul.f32 %v2561_v21, %v2187_v36  ;;  %vm1932_vm10 = vcmp.eq.s32.totalorder %v3792_v11, 0 }
 0x2da   : > { %v3450_v62 = vsel %vm1168_vm13, %v1074_v55, 0  ;;  %v1113_v2 = vcvt.f32.s32 %v1112_v10  ;;  %v1155_v37 = vcvt.f32.s32 %v1154_v0 }
 0x2db   : > { %1277 = vadd.xlane.f32.xlu1 %v1250_v18  ;;  %1271 = vadd.xlane.f32.xlu0 %v1247_v42  ;;  %vm1200_vm14 = vcmp.eq.s32.totalorder %v3792_v11, %v3450_v62 }
 0x2dc   : > { %v1116_v22 = vadd.s32 %v1115_v28, %v1113_v2  ;;  %vm2219_vm15 = vmpackc.low %vm1200_vm14, %vm1199_vm11  ;;  %v2188_v58 = vsel %vm1200_vm14, 1.0, %v2575_v30  ;;  %v1158_v12 = vadd.s32 %v1157_v47, %v1155_v37  ;;  %vm1949_vm11 = vcmp.eq.s32.totalorder %v3792_v11, 1 }
 0x2dd   : > { %v1126_v49 = vpop.xlane.xlu1 %1125  ;;  %2405 = vmatprep.mubr.msk.bf16.mxu0 %vm2219_vm15, %v2576_v61  ;;  %v721_v24 = vpop.xlane.xlu0 %720  ;;  %v1248_v13 = vmul.f32 %v2562_v16, %v2188_v58 }
 0x2de   : > { %v1127_v54 = vcvt.f32.s32 %v1126_v49  ;;  %v738_v50 = vmax.f32 %v721_v24, 1e-30  ;;  %vm1173_vm2 = vcmp.gt.f32.partialorder %v721_v24, 0.0  ;;  %2406 = vmatmul.mubr.msk.bf16.gmra.mrb[24].mxu0 %vm3443_vm12, %v2576_v61  ;;  %v3465_v46 = vsel %vm1171_vm1, %v1116_v22, 0 }
 0x2df   : > { %v3467_v35 = vsel %vm1173_vm2, %v1144_v4, 0  ;;  %1273 = vadd.xlane.f32.xlu1 %v1248_v13  ;;  %vm1203_vm3 = vcmp.eq.s32.totalorder %v3792_v11, %v3465_v46  ;;  %v1952_v49 = vcvt.s32.f32 %v3308_v38  ;;  %v1953_v38 = vcvt.s32.f32 %v3323_v27 }
 0x2e0   : > { %v1130_v29 = vadd.s32 %v1129_v26, %v1127_v54  ;;  %2547 = vrcp.f32 %v738_v50  ;;  %vm1205_vm4 = vcmp.eq.s32.totalorder %v3792_v11, %v3467_v35  ;;  %v2191_v15 = vsel %vm1203_vm3, 1.0, %v2575_v30 }
 0x2e1   : > { %v723_v3 = vpop.xlane.xlu1 %722  ;;  %v1251_v6 = vmul.f32 %v2563_v44, %v2191_v15  ;;  %v2193_v14 = vsel %vm1205_vm4, 1.0, %v2575_v30  ;;  %v1950_v50 = vcvt.s32.f32 %v3325_v41  ;;  %vm1661_vm12 = vcmask 261120  }
 0x2e2   : > { %v3478_v20 = vsel %vm1172_vm0, %v1130_v29, 0  ;;  %v739_v43 = vmax.f32 %v723_v3, 1e-30  ;;  %vm1174_vm5 = vcmp.gt.f32.partialorder %v723_v3, 0.0  ;;  %v1253_v9 = vmul.f32 %v2565_v53, %v2193_v14 }
 0x2e3   : > { %v3481_v57 = vsel %vm1174_vm5, %v1158_v12, 0  ;;  %vm1204_vm6 = vcmp.eq.s32.totalorder %v3792_v11, %v3478_v20  ;;  %1279 = vadd.xlane.f32.xlu0 %v1251_v6  ;;  %v1951_v6 = vcvt.s32.f32 %v3348_v39  ;;  %v1956_v14 = vcvt.s32.f32 %v3350_v23 }
 0x2e4   : > { %2549 = vrcp.f32 %v739_v43  ;;  %vm1206_vm7 = vcmp.eq.s32.totalorder %v3792_v11, %v3481_v57  ;;  %vm2223_vm8 = vmpackc.low %vm1204_vm6, %vm1203_vm3  ;;  %v2192_v31 = vsel %vm1204_vm6, 1.0, %v2575_v30 }
 0x2e5   : > { %2409 = vmatprep.mubr.msk.bf16.mxu0 %vm2223_vm8, %v2576_v61  ;;  %vm2225_vm9 = vmpackc.low %vm1206_vm7, %vm1205_vm4  ;;  %v1252_v52 = vmul.f32 %v2564_v34, %v2192_v31  ;;  %v2194_v19 = vsel %vm1206_vm7, 1.0, %v2575_v30  ;;  %v2516_v30 = vld [vmem:[%s3748_s7 + $0x8] sm:$0xff]  }
 0x2e6   : > { %2410 = vmatmul.mubr.msk.bf16.gmra.mrb[28].mxu0 %vm2225_vm9, %v2576_v61  ;;  %v1254_v33 = vmul.f32 %v2566_v17, %v2194_v19  ;;  %v2515_v61 = vld [vmem:[%s3748_s7] sm:$0xff]  }
 0x2e7   : > { %1281 = vadd.xlane.f32.xlu1 %v1252_v52  ;;  %1283 = vadd.xlane.f32.xlu0 %v1253_v9 }
 0x2e8   : > { %2453 = vmatprep.subr.bf16.mxu1 %v2515_v61  ;;  %2413 = vmatprep.subr.bf16.mxu0 %v2515_v61 }
 0x2e9   : > { %2455 = vmatpush3.bf16.msra.mxu1 %v2515_v61  ;;  %2414 = vmatpush3.bf16.msra.mxu0 %v2515_v61 }
 0x2ea   : > { %v2548_v55 = vpop.eup %2547  ;;  %2415 = vmatprep.subr.bf16.mxu0 %v2516_v30  ;;  %2454 = vmatprep.subr.bf16.mxu1 %v2516_v30 }
 0x2eb   : > { %v769_v51 = vmul.f32 %v2548_v55, %v2877_v45  ;;  %1285 = vadd.xlane.f32.xlu1 %v1254_v33  ;;  %v3517_v45 = vld [vmem:[%s3747_s6] sm:$0xff]   ;;  %v1957_v33 = vcvt.s32.f32 %v3373_v8  ;;  %v1954_v55 = vcvt.s32.f32 %v3375_v32  ;;  %v1955_v8 = vcvt.s32.f32 %v3399_v63 }
 0x2ec   : > { %v1960_v32 = vcvt.s32.f32 %v3401_v56  ;;  %v1961_v63 = vcvt.s32.f32 %v3425_v25  ;;  %v1958_v56 = vcvt.s32.f32 %v3427_v48  ;;  %v1959_v25 = vcvt.s32.f32 %v3450_v62 }
 0x2ed   : > { %786 = vst [vmem:[%s3214_s11 + $0x70] sm:$0xff] %v769_v51  ;;  %2416 = vmatpush3.bf16.msra.mxu0 %v2516_v30  ;;  %2456 = vmatpush3.bf16.msra.mxu1 %v2516_v30  ;;  %v1963_v62 = vcvt.s32.f32 %v3478_v20  ;;  %v1965_v20 = vcvt.s32.f32 %v3481_v57 }
 0x2ee   : > { %v2550_v36 = vpop.eup %2549  ;;  %2433 = vmatprep.subr.bf16.mxu1 %v3517_v45 }
 0x2ef   : > { %v771_v40 = vmul.f32 %v2550_v36, %v2895_v59 }
 0x2f1   : > { %787 = vst [vmem:[%s3214_s11 + $0x78] sm:$0xff] %v771_v40 }
 0x33b   : > { %v3520_v59 = vpop.f32.mrb[0].mxu1 }
 0x33c   : > { %v3522_v1 = vpop.f32.mrb[1].mxu1 }
 0x33d   : > { %v3524_v0 = vpop.f32.mrb[2].mxu1 }
 0x33e   : > { %v1626_v10 = vpack.c.bf16 %v3524_v0, %v3520_v59  ;;  %v3528_v7 = vpop.f32.mrb[3].mxu1 }
 0x33f   : > { %v1625_v18 = vpack.c.bf16 %v3528_v7, %v3522_v1 }
 0x343   : > { %v3532_v21 = vpop.f32.mrb[4].mxu1 }
 0x344   : > { %v3534_v42 = vpop.f32.mrb[5].mxu1 }
 0x345   : > { %v3536_v28 = vpop.f32.mrb[6].mxu1 }
 0x346   : > { %v1628_v2 = vpack.c.bf16 %v3536_v28, %v3532_v21  ;;  %v3540_v60 = vpop.f32.mrb[7].mxu1 }
 0x347   : > { %v1627_v5 = vpack.c.bf16 %v3540_v60, %v3534_v42 }
 0x34b   : > { %v3544_v26 = vpop.f32.mrb[8].mxu1 }
 0x34c   : > { %v3546_v22 = vpop.f32.mrb[9].mxu1 }
 0x34d   : > { %v3549_v58 = vpop.f32.mrb[10].mxu1 }
 0x34e   : > { %v1630_v4 = vpack.c.bf16 %v3549_v58, %v3544_v26  ;;  %v3554_v37 = vpop.f32.mrb[11].mxu1 }
 0x34f   : > { %v1629_v16 = vpack.c.bf16 %v3554_v37, %v3546_v22 }
 0x353   : > { %v3576_v15 = vpop.f32.mrb[12].mxu1 }
 0x354   : > { %v1260_v24 = vpop.xlane.xlu0 %1259  ;;  %v3582_v27 = vpop.f32.mrb[13].mxu1 }
 0x355   : > { %v1935_v13 = vsel %vm1932_vm10, %v1260_v24, 0.0  ;;  %v3586_v41 = vpop.f32.mrb[14].mxu1 }
 0x356   : > { %v1968_v54 = vsel %vm1949_vm11, %v1952_v49, %v1935_v13  ;;  %v1632_v52 = vpack.c.bf16 %v3586_v41, %v3576_v15  ;;  %v3596_v19 = vpop.f32.mrb[15].mxu1 }
 0x357   : > { %1984 = vst [vmem:[%s3561_s12 + $0x10] sm:$0xff] %v1968_v54  ;;  %v1631_v17 = vpack.c.bf16 %v3596_v19, %v3582_v27 }
 0x358   : > { %v1262_v47 = vpop.xlane.xlu1 %1261  ;;  %v1256_v29 = vpop.xlane.xlu0 %1255 }
 0x359   : > { %v1936_v12 = vsel %vm1932_vm10, %v1262_v47, 0.0  ;;  %v1933_v3 = vsel %vm1932_vm10, %v1256_v29, 0.0 }
 0x35a   : > { %v1969_v43 = vsel %vm1949_vm11, %v1953_v38, %v1936_v12  ;;  %v1966_v44 = vsel %vm1949_vm11, %v1950_v50, %v1933_v3 }
 0x35b   : > { %1985 = vst [vmem:[%s3561_s12 + $0x18] sm:$0xff] %v1969_v43  ;;  %1982 = vst [vmem:[%s3561_s12] sm:$0xff] %v1966_v44 }
 0x35c   : > { %v1258_v31 = vpop.xlane.xlu1 %1257  ;;  %v1268_v34 = vpop.xlane.xlu0 %1267 }
 0x35d   : > { %v1934_v53 = vsel %vm1932_vm10, %v1258_v31, 0.0  ;;  %v1939_v9 = vsel %vm1932_vm10, %v1268_v34, 0.0  ;;  %v1962_v34 = vcvt.s32.f32 %v3465_v46 }
 0x35e   : > { %v1967_v39 = vsel %vm1949_vm11, %v1951_v6, %v1934_v53  ;;  %v1972_v23 = vsel %vm1949_vm11, %v1956_v14, %v1939_v9 }
 0x35f   : > { %1983 = vst [vmem:[%s3561_s12 + $0x8] sm:$0xff] %v1967_v39  ;;  %1988 = vst [vmem:[%s3561_s12 + $0x30] sm:$0xff] %v1972_v23 }
 0x360   : > { %v1270_v51 = vpop.xlane.xlu1 %1269  ;;  %v1264_v36 = vpop.xlane.xlu0 %1263 }
 0x361   : > { %v1940_v40 = vsel %vm1932_vm10, %v1270_v51, 0.0  ;;  %v1937_v61 = vsel %vm1932_vm10, %v1264_v36, 0.0 }
 0x362   : > { %v1973_v30 = vsel %vm1949_vm11, %v1957_v33, %v1940_v40  ;;  %v1970_v49 = vsel %vm1949_vm11, %v1954_v55, %v1937_v61  ;;  %v1964_v33 = vcvt.s32.f32 %v3467_v35 }
 0x363   : > { %1989 = vst [vmem:[%s3561_s12 + $0x38] sm:$0xff] %v1973_v30  ;;  %1986 = vst [vmem:[%s3561_s12 + $0x20] sm:$0xff] %v1970_v49 }
 0x364   : > { %v1266_v24 = vpop.xlane.xlu1 %1265  ;;  %v1276_v13 = vpop.xlane.xlu0 %1275 }
 0x365   : > { %v1938_v54 = vsel %vm1932_vm10, %v1266_v24, 0.0  ;;  %v1943_v38 = vsel %vm1932_vm10, %v1276_v13, 0.0 }
 0x366   : > { %v1971_v50 = vsel %vm1949_vm11, %v1955_v8, %v1938_v54  ;;  %v1976_v47 = vsel %vm1949_vm11, %v1960_v32, %v1943_v38 }
 0x367   : > { %1987 = vst [vmem:[%s3561_s12 + $0x28] sm:$0xff] %v1971_v50  ;;  %1992 = vst [vmem:[%s3561_s12 + $0x50] sm:$0xff] %v1976_v47 }
 0x368   : > { %v1278_v29 = vpop.xlane.xlu1 %1277  ;;  %v1272_v12 = vpop.xlane.xlu0 %1271 }
 0x369   : > { %v1944_v3 = vsel %vm1932_vm10, %v1278_v29, 0.0  ;;  %v1941_v43 = vsel %vm1932_vm10, %v1272_v12, 0.0 }
 0x36a   : > { %v1977_v44 = vsel %vm1949_vm11, %v1961_v63, %v1944_v3  ;;  %v1974_v6 = vsel %vm1949_vm11, %v1958_v56, %v1941_v43 }
 0x36b   : > { %1993 = vst [vmem:[%s3561_s12 + $0x58] sm:$0xff] %v1977_v44  ;;  %1990 = vst [vmem:[%s3561_s12 + $0x40] sm:$0xff] %v1974_v6  ;;  %v2518_v6 = vld [vmem:[%s3747_s6 + $0x8] sm:$0xff]  }
 0x36c   : > { %v1274_v48 = vpop.xlane.xlu1 %1273 }
 0x36d   : > { %v1942_v14 = vsel %vm1932_vm10, %v1274_v48, 0.0 }
 0x36e   : > { %v1975_v31 = vsel %vm1949_vm11, %v1959_v25, %v1942_v14 }
 0x36f   : > { %1991 = vst [vmem:[%s3561_s12 + $0x48] sm:$0xff] %v1975_v31 }
 0x370   : > { %v1280_v53 = vpop.xlane.xlu0 %1279 }
 0x371   : > { %v1945_v9 = vsel %vm1932_vm10, %v1280_v53, 0.0 }
 0x372   : > { %v1978_v39 = vsel %vm1949_vm11, %v1962_v34, %v1945_v9 }
 0x373   : > { %1994 = vst [vmem:[%s3561_s12 + $0x60] sm:$0xff] %v1978_v39 }
 0x374   : > { %v1282_v23 = vpop.xlane.xlu1 %1281  ;;  %v1284_v51 = vpop.xlane.xlu0 %1283 }
 0x375   : > { %v1946_v55 = vsel %vm1932_vm10, %v1282_v23, 0.0  ;;  %v1947_v36 = vsel %vm1932_vm10, %v1284_v51, 0.0 }
 0x376   : > { %v1979_v46 = vsel %vm1949_vm11, %v1963_v62, %v1946_v55  ;;  %v1980_v40 = vsel %vm1949_vm11, %v1964_v33, %v1947_v36 }
 0x377   : > { %1995 = vst [vmem:[%s3561_s12 + $0x68] sm:$0xff] %v1979_v46  ;;  %1996 = vst [vmem:[%s3561_s12 + $0x70] sm:$0xff] %v1980_v40 }
 0x378   : > { %v1286_v61 = vpop.xlane.xlu1 %1285 }
 0x379   : > { %v1948_v35 = vsel %vm1932_vm10, %v1286_v61, 0.0 }
 0x37a   : > { %v1981_v30 = vsel %vm1949_vm11, %v1965_v20, %v1948_v35 }
 0x37b   : > { %1997 = vst [vmem:[%s3561_s12 + $0x78] sm:$0xff] %v1981_v30 }
 0x3a1   : > { %v2399_v49 = vpop.f32.mrb[16].mxu0 }
 0x3a2   : > { %v1562_v8 = vpop.f32.mrb[17].mxu0 }
 0x3a3   : > { %v2400_v32 = vpop.f32.mrb[18].mxu0 }
 0x3a4   : > { %v1638_v24 = vpack.c.bf16 %v2400_v32, %v2399_v49  ;;  %v1565_v13 = vpop.f32.mrb[19].mxu0 }
 0x3a5   : > { %v1637_v54 = vpack.c.bf16 %v1565_v13, %v1562_v8 }
 0x3a7   : > { %2417 = vmatprep.mubr.msk.bf16.mxu0 %vm1661_vm12, %v1637_v54 }
 0x3a8   : > { %2418 = vmatmul.mubr.msk.bf16.vlgmr.msra.gmra.mrb[32].mxu0 %vm1661_vm12, %v1638_v24 }
 0x3a9   : > { %v2403_v57 = vpop.f32.mrb[20].mxu0 }
 0x3aa   : > { %v1578_v38 = vpop.f32.mrb[21].mxu0 }
 0x3ab   : > { %v2404_v50 = vpop.f32.mrb[22].mxu0 }
 0x3ac   : > { %v1640_v47 = vpack.c.bf16 %v2404_v50, %v2403_v57  ;;  %v1581_v63 = vpop.f32.mrb[23].mxu0 }
 0x3ad   : > { %v1639_v56 = vpack.c.bf16 %v1581_v63, %v1578_v38 }
 0x3af   : > { %2421 = vmatprep.mubr.msk.bf16.mxu0 %vm1661_vm12, %v1639_v56 }
 0x3b0   : > { %2422 = vmatmul.mubr.msk.bf16.gmra.mrb[36].mxu0 %vm1661_vm12, %v1640_v47 }
 0x3b1   : > { %v2407_v11 = vpop.f32.mrb[24].mxu0 }
 0x3b2   : > { %v1594_v29 = vpop.f32.mrb[25].mxu0 }
 0x3b3   : > { %v2408_v12 = vpop.f32.mrb[26].mxu0 }
 0x3b4   : > { %v1642_v3 = vpack.c.bf16 %v2408_v12, %v2407_v11  ;;  %v1597_v43 = vpop.f32.mrb[27].mxu0 }
 0x3b5   : > { %v1641_v44 = vpack.c.bf16 %v1597_v43, %v1594_v29 }
 0x3b7   : > { %2425 = vmatprep.mubr.msk.bf16.mxu1 %vm1661_vm12, %v1641_v44 }
 0x3b8   : > { %2426 = vmatmul.mubr.msk.bf16.vlgmr.msra.gmra.mrb[16].mxu1 %vm1661_vm12, %v1642_v3 }
 0x3b9   : > { %2434 = vmatpush3.bf16.msra.mxu1 %v3517_v45  ;;  %v2411_v25 = vpop.f32.mrb[28].mxu0 }
 0x3ba   : > { %v1610_v48 = vpop.f32.mrb[29].mxu0  ;;  %2435 = vmatprep.subr.bf16.mxu1 %v2518_v6 }
 0x3bb   : > { %v2412_v14 = vpop.f32.mrb[30].mxu0 }
 0x3bc   : > { %v1644_v31 = vpack.c.bf16 %v2412_v14, %v2411_v25  ;;  %v1613_v34 = vpop.f32.mrb[31].mxu0 }
 0x3bd   : > { %v1643_v53 = vpack.c.bf16 %v1613_v34, %v1610_v48  ;;  %2436 = vmatpush3.bf16.msra.mxu1 %v2518_v6 }
 0x3bf   : > { %2429 = vmatprep.mubr.msk.bf16.mxu1 %vm1661_vm12, %v1643_v53 }
 0x3c0   : > { %2430 = vmatmul.mubr.msk.bf16.gmra.mrb[20].mxu1 %vm1661_vm12, %v1644_v31 }
 0x3c1   : > { %2437 = vmatprep.mubr.msk.bf16.mxu1 %vm1661_vm12, %v1625_v18 }
 0x3c8   : > { %2438 = vmatmul.mubr.msk.bf16.vlgmr.msra.gmra.mrb[24].mxu1 %vm1661_vm12, %v1626_v10 }
 0x3c9   : > { %2441 = vmatprep.mubr.msk.bf16.mxu1 %vm1661_vm12, %v1627_v5 }
 0x3d0   : > { %2442 = vmatmul.mubr.msk.bf16.gmra.mrb[28].mxu1 %vm1661_vm12, %v1628_v2 }
 0x3d1   : > { %2445 = vmatprep.mubr.msk.bf16.mxu1 %vm1661_vm12, %v1629_v16 }
 0x3d8   : > { %2446 = vmatmul.mubr.msk.bf16.gmra.mrb[16].mxu1 %vm1661_vm12, %v1630_v4 }
 0x3d9   : > { %2449 = vmatprep.mubr.msk.bf16.mxu1 %vm1661_vm12, %v1631_v17 }
 0x3e0   : > { %2450 = vmatmul.mubr.msk.bf16.gmra.mrb[20].mxu1 %vm1661_vm12, %v1632_v52 }
 0x47b   : > { %v2419_v45 = vpop.f32.mrb[32].mxu0 }
 0x47c   : > { %v1720_v59 = vpop.f32.mrb[33].mxu0 }
 0x47d   : > { %v2420_v1 = vpop.f32.mrb[34].mxu0 }
 0x47e   : > { %v1723_v0 = vpop.f32.mrb[35].mxu0 }
 0x483   : > { %v2423_v10 = vpop.f32.mrb[36].mxu0 }
 0x484   : > { %v1736_v7 = vpop.f32.mrb[37].mxu0 }
 0x485   : > { %v2424_v18 = vpop.f32.mrb[38].mxu0 }
 0x486   : > { %v1739_v21 = vpop.f32.mrb[39].mxu0 }
 0x49b   : > { %v2439_v42 = vpop.f32.mrb[24].mxu1 }
 0x49c   : > { %v1862_v28 = vadd.f32 %v2439_v42, %v2419_v45  ;;  %v1853_v2 = vpop.f32.mrb[25].mxu1 }
 0x49d   : > { %v1854_v60 = vadd.f32 %v1853_v2, %v1720_v59  ;;  %v2440_v5 = vpop.f32.mrb[26].mxu1 }
 0x49e   : > { %1918 = vst [vmem:[%s3720_s20 + $0x10] sm:$0xff] %v1862_v28  ;;  %v1865_v26 = vadd.f32 %v2440_v5, %v2420_v1  ;;  %v1856_v22 = vpop.f32.mrb[27].mxu1 }
 0x49f   : > { %1916 = vst [vmem:[%s3720_s20] sm:$0xff] %v1854_v60  ;;  %v1857_v58 = vadd.f32 %v1856_v22, %v1723_v0 }
 0x4a0   : > { %1919 = vst [vmem:[%s3720_s20 + $0x18] sm:$0xff] %v1865_v26 }
 0x4a1   : > { %1917 = vst [vmem:[%s3720_s20 + $0x8] sm:$0xff] %v1857_v58 }
 0x4a3   : > { %v2443_v4 = vpop.f32.mrb[28].mxu1 }
 0x4a4   : > { %v1878_v37 = vadd.f32 %v2443_v4, %v2423_v10  ;;  %v1869_v16 = vpop.f32.mrb[29].mxu1 }
 0x4a5   : > { %v1870_v15 = vadd.f32 %v1869_v16, %v1736_v7  ;;  %v2444_v27 = vpop.f32.mrb[30].mxu1 }
 0x4a6   : > { %1922 = vst [vmem:[%s3720_s20 + $0x30] sm:$0xff] %v1878_v37  ;;  %v1881_v41 = vadd.f32 %v2444_v27, %v2424_v18  ;;  %v1872_v52 = vpop.f32.mrb[31].mxu1 }
 0x4a7   : > { %1920 = vst [vmem:[%s3720_s20 + $0x20] sm:$0xff] %v1870_v15  ;;  %v1873_v19 = vadd.f32 %v1872_v52, %v1739_v21 }
 0x4a8   : > { %1923 = vst [vmem:[%s3720_s20 + $0x38] sm:$0xff] %v1881_v41 }
 0x4a9   : > { %1921 = vst [vmem:[%s3720_s20 + $0x28] sm:$0xff] %v1873_v19 }
 0x4ab   : > { %v2447_v17 = vpop.f32.mrb[16].mxu1 }
 0x4ac   : > { %1926 = vst [vmem:[%s3720_s20 + $0x50] sm:$0xff] %v2447_v17  ;;  %v1885_v9 = vpop.f32.mrb[17].mxu1 }
 0x4ad   : > { %1924 = vst [vmem:[%s3720_s20 + $0x40] sm:$0xff] %v1885_v9  ;;  %v2448_v39 = vpop.f32.mrb[18].mxu1 }
 0x4ae   : > { %1927 = vst [vmem:[%s3720_s20 + $0x58] sm:$0xff] %v2448_v39  ;;  %v1888_v62 = vpop.f32.mrb[19].mxu1 }
 0x4af   : > { %1925 = vst [vmem:[%s3720_s20 + $0x48] sm:$0xff] %v1888_v62 }
 0x4b3   : > { %v2451_v23 = vpop.f32.mrb[20].mxu1 }
 0x4b4   : > { %1930 = vst [vmem:[%s3720_s20 + $0x70] sm:$0xff] %v2451_v23  ;;  %v1901_v33 = vpop.f32.mrb[21].mxu1 }
 0x4b5   : > { %1928 = vst [vmem:[%s3720_s20 + $0x60] sm:$0xff] %v1901_v33  ;;  %v2452_v55 = vpop.f32.mrb[22].mxu1 }
 0x4b6   : > { %1931 = vst [vmem:[%s3720_s20 + $0x78] sm:$0xff] %v2452_v55  ;;  %v1904_v51 = vpop.f32.mrb[23].mxu1 }
 0x4b7   : > { %1929 = vst [vmem:[%s3720_s20 + $0x68] sm:$0xff] %v1904_v51 }
 0x4b8 PF: > { %s21_s13 = sadd.s32 1, %s2573_s13  }
 0x4b9   : > { %p18_p4 = scmp.ge.s32.totalorder %s21_s13, 4  }
 0x4bb   :  { %20 = sbr.rel (!%p18_p4) target bundleno = 1 (0x1), region = 112 }

</bundles_post_ra>
